<compile_context>
chip_gen: v7x
topology: tpu7x:2x2x1
jax: 0.10.0
libtpu: 0.0.40
codegen_flags: <defaults>
</compile_context>

<pallas_src>
import jax
import jax.numpy as jnp
from jax.experimental import pallas as pl
from jax.experimental.pallas import tpu as pltpu

K_IN = 28 * 28   # 784
H = 512          # hidden width
N_OUT = 10
N_PAD = 128      # lane-dense padded output width (multiple of 128)


def mlp_kernel(x_ref, w1_ref, b1_ref, w2_ref, b2_ref, w3_ref, b3_ref, o_ref):
    # Layer 1: (TB, 784) bf16 @ (784, 512) bf16 -> f32 acc; bias/ReLU in f32.
    h1 = jnp.dot(x_ref[...], w1_ref[...], preferred_element_type=jnp.float32)
    h1 = jnp.maximum(h1 + b1_ref[...], 0.0)
    # Layer 2: cast activation to bf16 only at the MXU input.
    h2 = jnp.dot(h1.astype(jnp.bfloat16), w2_ref[...],
                 preferred_element_type=jnp.float32)
    h2 = jnp.maximum(h2 + b2_ref[...], 0.0)
    # Layer 3 (lane-dense, padded to 128 output columns). Store as bf16.
    logits = jnp.dot(h2.astype(jnp.bfloat16), w3_ref[...],
                     preferred_element_type=jnp.float32)
    o_ref[...] = (logits + b3_ref[...]).astype(o_ref.dtype)


def prepare_params(params):
    """One-time parameter prep (do at init, NOT per forward call):
    bf16 weight casts + lane-dense zero-padding of the final layer to 128 cols."""
    w1, b1, w2, b2, w3, b3 = params
    w3p = jnp.pad(w3, ((0, 0), (0, N_PAD - w3.shape[1])))
    b3p = jnp.pad(b3, ((0, 0), (0, N_PAD - b3.shape[1])))
    return (w1.astype(jnp.bfloat16), b1.astype(jnp.float32),
            w2.astype(jnp.bfloat16), b2.astype(jnp.float32),
            w3p.astype(jnp.bfloat16), b3p.astype(jnp.float32))


def mlp_forward(x_nchw, prepared):
    w1b, b1f, w2b, b2f, w3b, b3f = prepared
    B = x_nchw.shape[0]

    # nn.Flatten() fused with the single bf16 cast (no intermediate f32 copy).
    xb = x_nchw.reshape(B, -1).astype(jnp.bfloat16)
    K = xb.shape[1]          # 784 — no K padding; full-dim block is legal.

    # Batch tiling: weights VMEM-resident, x/out tiles pipelined over the batch.
    TB = min(512, max(8, ((B + 7) // 8) * 8))
    grid = (pl.cdiv(B, TB),)   # partial last block handled by Pallas masking

    out = pl.pallas_call(
        mlp_kernel,
        out_shape=jax.ShapeDtypeStruct((B, N_PAD), jnp.bfloat16),
        grid=grid,
        in_specs=[
            pl.BlockSpec((TB, K), lambda i: (i, 0)),      # x: tiled over batch
            pl.BlockSpec((K, H), lambda i: (0, 0)),       # w1: resident
            pl.BlockSpec((1, H), lambda i: (0, 0)),       # b1: resident
            pl.BlockSpec((H, H), lambda i: (0, 0)),       # w2: resident
            pl.BlockSpec((1, H), lambda i: (0, 0)),       # b2: resident
            pl.BlockSpec((H, N_PAD), lambda i: (0, 0)),   # w3: resident (padded)
            pl.BlockSpec((1, N_PAD), lambda i: (0, 0)),   # b3: resident (padded)
        ],
        out_specs=pl.BlockSpec((TB, N_PAD), lambda i: (i, 0)),
        compiler_params=pltpu.CompilerParams(
            dimension_semantics=("parallel",),
            vmem_limit_bytes=32 * 1024 * 1024,   # headroom for TB=512 tiles on v5e
        ),
    )(xb, w1b, b1f, w2b, b2f, w3b, b3f)

    # Drop the padded output columns; cast back to f32 for downstream use.
    return out[:, :N_OUT].astype(jnp.float32)


def init_params(key):
    """Deterministic init matching the torch module's layer shapes.
    Weights stored as (in_features, out_features); biases as (1, out_features)."""
    k1, k2, k3, k4, k5, k6 = jax.random.split(key, 6)

    def uniform(k, shape, fan_in):
        bound = 1.0 / jnp.sqrt(fan_in)
        return jax.random.uniform(k, shape, jnp.float32, -bound, bound)

    w1 = uniform(k1, (K_IN, H), float(K_IN))
    b1 = uniform(k2, (1, H), float(K_IN))
    w2 = uniform(k3, (H, H), float(H))
    b2 = uniform(k4, (1, H), float(H))
    w3 = uniform(k5, (H, N_OUT), float(H))
    b3 = uniform(k6, (1, N_OUT), float(H))
    return (w1, b1, w2, b2, w3, b3)


def reference_forward_f32(x_nchw, params):
    w1, b1, w2, b2, w3, b3 = params
    x = x_nchw.reshape(x_nchw.shape[0], -1)
    h1 = jnp.maximum(x @ w1 + b1, 0.0)
    h2 = jnp.maximum(h1 @ w2 + b2, 0.0)
    return h2 @ w3 + b3


def reference_forward_bf16(x_nchw, params):
    """Mirrors the kernel's bf16 matmul inputs / f32 accumulation."""
    w1, b1, w2, b2, w3, b3 = params
    x = x_nchw.reshape(x_nchw.shape[0], -1).astype(jnp.bfloat16)
    w1b, w2b, w3b = (w.astype(jnp.bfloat16) for w in (w1, w2, w3))
    h1 = jnp.maximum(
        jnp.dot(x, w1b, preferred_element_type=jnp.float32) + b1, 0.0)
    h2 = jnp.maximum(
        jnp.dot(h1.astype(jnp.bfloat16), w2b,
                preferred_element_type=jnp.float32) + b2, 0.0)
    return jnp.dot(h2.astype(jnp.bfloat16), w3b,
                   preferred_element_type=jnp.float32) + b3


if __name__ == "__main__":
    key = jax.random.PRNGKey(0)
    kp, kx = jax.random.split(key)
    params = init_params(kp)
    prepared = prepare_params(params)   # one-time: hoisted out of the call path

    # MNIST-like input: batch=8, NCHW (B, 1, 28, 28)
    x = jax.random.normal(kx, (8, 1, 28, 28), dtype=jnp.float32)

    logits = mlp_forward(x, prepared)
    jax.block_until_ready(logits)
    assert logits.shape == (8, 10)

    # Tight check against a reference using the same bf16 matmul inputs
    # (slightly looser than before because the kernel now stores bf16 output).
    ref_bf16 = reference_forward_bf16(x, params)
    assert jnp.allclose(logits, ref_bf16, atol=2e-2, rtol=2e-2)

    # Loose check against the pure-f32 reference (bf16 rounding of inputs/output).
    ref_f32 = reference_forward_f32(x, params)
    assert jnp.allclose(logits, ref_f32, atol=6e-2, rtol=6e-2)

    print("KERNEL_OK")
</pallas_src>

<mosaic_0001>
module attributes {stable_mosaic.version = 11 : i64} {
  func.func @mlp_kernel(%arg0: i32, %arg1: memref<8x784xbf16, #tpu.memory_space<vmem>>, %arg2: memref<784x512xbf16, #tpu.memory_space<vmem>>, %arg3: memref<1x512xf32, #tpu.memory_space<vmem>>, %arg4: memref<512x512xbf16, #tpu.memory_space<vmem>>, %arg5: memref<1x512xf32, #tpu.memory_space<vmem>>, %arg6: memref<512x128xbf16, #tpu.memory_space<vmem>>, %arg7: memref<1x128xf32, #tpu.memory_space<vmem>>, %arg8: memref<8x128xbf16, #tpu.memory_space<vmem>>) attributes {dimension_semantics = [#tpu.dimension_semantics<parallel>], iteration_bounds = array<i64: 1>, scalar_prefetch = 0 : i64, scratch_operands = 0 : i64, tpu.core_type = #tpu.core_type<tc>, window_params = [{transform_indices = @transform_0, window_bounds = array<i64: 8, 784>}, {pipeline_mode = #tpu.pipeline_mode<synchronous>, transform_indices = @transform_1, window_bounds = array<i64: 784, 512>}, {pipeline_mode = #tpu.pipeline_mode<synchronous>, transform_indices = @transform_2, window_bounds = array<i64: 1, 512>}, {pipeline_mode = #tpu.pipeline_mode<synchronous>, transform_indices = @transform_3, window_bounds = array<i64: 512, 512>}, {pipeline_mode = #tpu.pipeline_mode<synchronous>, transform_indices = @transform_4, window_bounds = array<i64: 1, 512>}, {pipeline_mode = #tpu.pipeline_mode<synchronous>, transform_indices = @transform_5, window_bounds = array<i64: 512, 128>}, {pipeline_mode = #tpu.pipeline_mode<synchronous>, transform_indices = @transform_6, window_bounds = array<i64: 1, 128>}, {transform_indices = @transform_7, window_bounds = array<i64: 8, 128>}]} {
    %c0 = arith.constant 0 : index
    %c0_0 = arith.constant 0 : index
    %0 = vector.load %arg1[%c0, %c0_0] : memref<8x784xbf16, #tpu.memory_space<vmem>>, vector<8x784xbf16>
    %c0_1 = arith.constant 0 : index
    %c0_2 = arith.constant 0 : index
    %1 = vector.load %arg2[%c0_1, %c0_2] : memref<784x512xbf16, #tpu.memory_space<vmem>>, vector<784x512xbf16>
    %cst = arith.constant dense<0.000000e+00> : vector<8x512xf32>
    %2 = tpu.matmul %0, %1, %cst {dimension_numbers = #tpu.dot_dimension_numbers<[1], [0], [0], [1], [0, 0, 1, 1], [], []>} : vector<8x784xbf16>, vector<784x512xbf16>, vector<8x512xf32> -> vector<8x512xf32>
    %c0_3 = arith.constant 0 : index
    %c0_4 = arith.constant 0 : index
    %3 = vector.load %arg3[%c0_3, %c0_4] : memref<1x512xf32, #tpu.memory_space<vmem>>, vector<1x512xf32>
    %4 = vector.broadcast %3 : vector<1x512xf32> to vector<8x512xf32>
    %5 = arith.addf %2, %4 : vector<8x512xf32>
    %cst_5 = arith.constant 0.000000e+00 : f32
    %6 = vector.broadcast %cst_5 : f32 to vector<8x512xf32>
    %7 = arith.maximumf %5, %6 : vector<8x512xf32>
    %8 = arith.truncf %7 : vector<8x512xf32> to vector<8x512xbf16>
    %c0_6 = arith.constant 0 : index
    %c0_7 = arith.constant 0 : index
    %9 = vector.load %arg4[%c0_6, %c0_7] : memref<512x512xbf16, #tpu.memory_space<vmem>>, vector<512x512xbf16>
    %cst_8 = arith.constant dense<0.000000e+00> : vector<8x512xf32>
    %10 = tpu.matmul %8, %9, %cst_8 {dimension_numbers = #tpu.dot_dimension_numbers<[1], [0], [0], [1], [0, 0, 1, 1], [], []>} : vector<8x512xbf16>, vector<512x512xbf16>, vector<8x512xf32> -> vector<8x512xf32>
    %c0_9 = arith.constant 0 : index
    %c0_10 = arith.constant 0 : index
    %11 = vector.load %arg5[%c0_9, %c0_10] : memref<1x512xf32, #tpu.memory_space<vmem>>, vector<1x512xf32>
    %12 = vector.broadcast %11 : vector<1x512xf32> to vector<8x512xf32>
    %13 = arith.addf %10, %12 : vector<8x512xf32>
    %cst_11 = arith.constant 0.000000e+00 : f32
    %14 = vector.broadcast %cst_11 : f32 to vector<8x512xf32>
    %15 = arith.maximumf %13, %14 : vector<8x512xf32>
    %16 = arith.truncf %15 : vector<8x512xf32> to vector<8x512xbf16>
    %c0_12 = arith.constant 0 : index
    %c0_13 = arith.constant 0 : index
    %17 = vector.load %arg6[%c0_12, %c0_13] : memref<512x128xbf16, #tpu.memory_space<vmem>>, vector<512x128xbf16>
    %cst_14 = arith.constant dense<0.000000e+00> : vector<8x128xf32>
    %18 = tpu.matmul %16, %17, %cst_14 {dimension_numbers = #tpu.dot_dimension_numbers<[1], [0], [0], [1], [0, 0, 1, 1], [], []>} : vector<8x512xbf16>, vector<512x128xbf16>, vector<8x128xf32> -> vector<8x128xf32>
    %c0_15 = arith.constant 0 : index
    %c0_16 = arith.constant 0 : index
    %19 = vector.load %arg7[%c0_15, %c0_16] : memref<1x128xf32, #tpu.memory_space<vmem>>, vector<1x128xf32>
    %20 = vector.broadcast %19 : vector<1x128xf32> to vector<8x128xf32>
    %21 = arith.addf %18, %20 : vector<8x128xf32>
    %22 = arith.truncf %21 : vector<8x128xf32> to vector<8x128xbf16>
    %c0_17 = arith.constant 0 : index
    %c0_18 = arith.constant 0 : index
    %23 = vector.load %arg8[%c0_17, %c0_18] : memref<8x128xbf16, #tpu.memory_space<vmem>>, vector<8x128xbf16>
    tpu.vector_store %arg8[%c0_17, %c0_18], %22 {strides = array<i32>} : memref<8x128xbf16, #tpu.memory_space<vmem>>, vector<8x128xbf16>,
    return
  }
  func.func @transform_0(%arg0: i32) -> (i32, i32) {
    %c0_i32 = arith.constant 0 : i32
    %c0_i32_0 = arith.constant 0 : i32
    return %arg0, %c0_i32 : i32, i32
  }
  func.func @transform_1(%arg0: i32) -> (i32, i32) {
    %c0_i32 = arith.constant 0 : i32
    %c0_i32_0 = arith.constant 0 : i32
    %c0_i32_1 = arith.constant 0 : i32
    return %c0_i32, %c0_i32_0 : i32, i32
  }
  func.func @transform_2(%arg0: i32) -> (i32, i32) {
    %c0_i32 = arith.constant 0 : i32
    %c0_i32_0 = arith.constant 0 : i32
    %c0_i32_1 = arith.constant 0 : i32
    return %c0_i32, %c0_i32_0 : i32, i32
  }
  func.func @transform_3(%arg0: i32) -> (i32, i32) {
    %c0_i32 = arith.constant 0 : i32
    %c0_i32_0 = arith.constant 0 : i32
    %c0_i32_1 = arith.constant 0 : i32
    return %c0_i32, %c0_i32_0 : i32, i32
  }
  func.func @transform_4(%arg0: i32) -> (i32, i32) {
    %c0_i32 = arith.constant 0 : i32
    %c0_i32_0 = arith.constant 0 : i32
    %c0_i32_1 = arith.constant 0 : i32
    return %c0_i32, %c0_i32_0 : i32, i32
  }
  func.func @transform_5(%arg0: i32) -> (i32, i32) {
    %c0_i32 = arith.constant 0 : i32
    %c0_i32_0 = arith.constant 0 : i32
    %c0_i32_1 = arith.constant 0 : i32
    return %c0_i32, %c0_i32_0 : i32, i32
  }
  func.func @transform_6(%arg0: i32) -> (i32, i32) {
    %c0_i32 = arith.constant 0 : i32
    %c0_i32_0 = arith.constant 0 : i32
    %c0_i32_1 = arith.constant 0 : i32
    return %c0_i32, %c0_i32_0 : i32, i32
  }
  func.func @transform_7(%arg0: i32) -> (i32, i32) {
    %c0_i32 = arith.constant 0 : i32
    %c0_i32_0 = arith.constant 0 : i32
    return %arg0, %c0_i32 : i32, i32
  }
}

</mosaic_0001>

<bundles_post_ra>
// kernel: tpu_custom_call.1
= control target key start
LH: loop header
LB: loop body
LE: loop exit
PB: predicated region body
PF: predicated region fallthrough
CT: control target
= control target key end

     0   :  { %12 = vsyncpa [#allocation3], 0  ;;  %s4242_s0 = inlined_call_operand.hbm [shape: bf16[8,784], index: 0, kind: input, shape index: {}]   ;;  %s4243_s1 = inlined_call_operand.hbm [shape: bf16[784,512], index: 1, kind: input, shape index: {}]   ;;  %s4244_s2 = inlined_call_operand.vmem [shape: f32[1,512], index: 2, kind: input, shape index: {}]   ;;  %s4245_s3 = inlined_call_operand.hbm [shape: bf16[512,512], index: 3, kind: input, shape index: {}]   ;;  %s4246_s4 = inlined_call_operand.vmem [shape: f32[1,512], index: 4, kind: input, shape index: {}]   ;;  %s4247_s5 = inlined_call_operand.hbm [shape: bf16[512,128], index: 5, kind: input, shape index: {}]   ;;  %s4248_s6 = inlined_call_operand.vmem [shape: f32[1,128], index: 6, kind: input, shape index: {}]   ;;  %s4249_s7 = inlined_call_operand.hbm [shape: bf16[8,128], index: 7, kind: output, shape index: {}]  }
   0x1   :  { %13 = vsyncpa [#allocation6], 0 }
   0x2   :  { %14 = vsyncpa [#allocation9], 0 }
   0x3   :  { %15 = vsyncpa [#allocation4], 0  ;;  %s4074_s24 = smov [#allocation5]   ;;  %s3956_s28 = scalar_lea.hbm %s4243_s1, 25088 }
   0x4   :  { %s31_s25 = sshll.u32 %s4074_s24, 4  ;;  %p3957_p0 = scmp.ne.s32.totalorder %s4243_s1, %s3956_s28  ;;  %s32_s25 = int_to_ptr.vmem [resolvable:$true] %s31_s25 }
   0x5   :  { %p3960_p1 = scmp.lt.u32.totalorder %s3956_s28, %s4243_s1 }
   0x7   :  { %p3962_p2 = pnand %p3960_p1, %p3957_p0 }
   0x9   :  { %3965 = shalt.err (!%p3962_p2)
}
   0xa   :  { %s3966_s10 = scalar_lea.vmem %s32_s25, 25088  ;;  %p3971_p4 = scmp.lt.s32.totalorder %s32_s25, %s32_s25 }
   0xb   :  { %p3967_p3 = scmp.ne.s32.totalorder %s32_s25, %s3966_s10  ;;  %p3972_p5 = scmp.lt.s32.totalorder %s3966_s10, %s3966_s10 }
   0xd   :  { %p3973_p6 = por %p3972_p5, %p3971_p4 }
   0xf   :  { %p3974_p7 = pnand %p3973_p6, %p3967_p3 }
  0x11   :  { %3977 = shalt.err (!%p3974_p7)
}
  0x12   :  { %s4075_s11 = smov 256   ;;  %s4076_s12 = smov 16  }
  0x13   :  { %37 = dma.hbm_to_vmem [thread:$0]  %s4243_s1, 25088, %s32_s25, [#allocation6], %s4075_s11, %s4075_s11, %s4076_s12  }
  0x14   :  { %s4077_s15 = smov [#allocation2]   ;;  %s4078_s17 = smov [#allocation7]  }
  0x15   :  { %s22_s16 = sshll.u32 %s4077_s15, 4  ;;  %s45_s18 = sshll.u32 %s4078_s17, 4  ;;  %s23_s16 = int_to_ptr.vmem [resolvable:$true] %s22_s16  ;;  %s46_s18 = int_to_ptr.vmem [resolvable:$true] %s45_s18 }
  0x16   :  { %s3978_s21 = scalar_lea.hbm %s4242_s0, 448 }
  0x17   :  { %p3979_p8 = scmp.ne.s32.totalorder %s4242_s0, %s3978_s21  ;;  %p3982_p9 = scmp.lt.u32.totalorder %s3978_s21, %s4242_s0 }
  0x19   :  { %p3984_p10 = pnand %p3982_p9, %p3979_p8 }
  0x1b   :  { %3987 = shalt.err (!%p3984_p10)
}
  0x1c   :  { %s3988_s1 = scalar_lea.vmem %s23_s16, 448  ;;  %p3993_p12 = scmp.lt.s32.totalorder %s23_s16, %s23_s16 }
  0x1d   :  { %p3989_p11 = scmp.ne.s32.totalorder %s23_s16, %s3988_s1  ;;  %p3994_p13 = scmp.lt.s32.totalorder %s3988_s1, %s3988_s1 }
  0x1f   :  { %p3995_p0 = por %p3994_p13, %p3993_p12 }
  0x21   :  { %p3996_p1 = pnand %p3995_p0, %p3989_p11 }
  0x23   :  { %3999 = shalt.err (!%p3996_p1)
}
  0x24   :  { %25 = dma.hbm_to_vmem [thread:$0]  %s4242_s0, 448, %s23_s16, [#allocation3]  }
  0x25   :  { %s4000_s30 = scalar_lea.hbm %s4245_s3, 16384 }
  0x26   :  { %p4001_p2 = scmp.ne.s32.totalorder %s4245_s3, %s4000_s30  ;;  %p4004_p3 = scmp.lt.u32.totalorder %s4000_s30, %s4245_s3 }
  0x28   :  { %p4006_p4 = pnand %p4004_p3, %p4001_p2 }
  0x2a   :  { %4009 = shalt.err (!%p4006_p4)
}
  0x2b   :  { %s4010_s14 = scalar_lea.vmem %s46_s18, 16384  ;;  %p4015_p6 = scmp.lt.s32.totalorder %s46_s18, %s46_s18 }
  0x2c   :  { %p4011_p5 = scmp.ne.s32.totalorder %s46_s18, %s4010_s14  ;;  %p4016_p7 = scmp.lt.s32.totalorder %s4010_s14, %s4010_s14 }
  0x2e   :  { %p4017_p8 = por %p4016_p7, %p4015_p6 }
  0x30   :  { %p4018_p9 = pnand %p4017_p8, %p4011_p5 }
  0x32   :  { %4021 = shalt.err (!%p4018_p9)
}
  0x33   :  { %51 = dma.hbm_to_vmem [thread:$0]  %s4245_s3, 16384, %s46_s18, [#allocation6], %s4075_s11, %s4075_s11, %s4076_s12  }
  0x34   :  { %s4079_s16 = smov [#allocation8]   ;;  %s4022_s21 = scalar_lea.hbm %s4247_s5, 4096 }
  0x35   :  { %s59_s17 = sshll.u32 %s4079_s16, 4  ;;  %p4023_p10 = scmp.ne.s32.totalorder %s4247_s5, %s4022_s21  ;;  %s60_s17 = int_to_ptr.vmem [resolvable:$true] %s59_s17 }
  0x36   :  { %p4026_p11 = scmp.lt.u32.totalorder %s4022_s21, %s4247_s5 }
  0x38   :  { %p4028_p12 = pnand %p4026_p11, %p4023_p10 }
  0x3a   :  { %4031 = shalt.err (!%p4028_p12)
}
  0x3b   :  { %s4032_s1 = scalar_lea.vmem %s60_s17, 4096  ;;  %p4037_p0 = scmp.lt.s32.totalorder %s60_s17, %s60_s17 }
  0x3c   :  { %p4033_p13 = scmp.ne.s32.totalorder %s60_s17, %s4032_s1  ;;  %p4038_p1 = scmp.lt.s32.totalorder %s4032_s1, %s4032_s1 }
  0x3e   :  { %p4039_p2 = por %p4038_p1, %p4037_p0 }
  0x40   :  { %p4040_p3 = pnand %p4039_p2, %p4033_p13 }
  0x42   :  { %4043 = shalt.err (!%p4040_p3)
}
  0x43   :  { %s4080_s3 = smov 64   ;;  %s4081_s11 = smov 4  }
  0x44   :  { %65 = dma.hbm_to_vmem [thread:$0]  %s4247_s5, 4096, %s60_s17, [#allocation9], %s4080_s3, %s4080_s3, %s4081_s11  }
  0x45   :  { %4066 = dma.done.wait [#allocation3], 448  }
  0x46   :  { %4067 = vsyncadd [#allocation3], 4294966848 }
  0x47   :  { %4068 = dma.done.wait [#allocation6], 41472  }
  0x48   :  { %4069 = vsyncadd [#allocation6], 4294925824 }
  0x49   :  { %4070 = dma.done.wait [#allocation9], 4096  }
  0x4a   :  { %4071 = vsyncadd [#allocation9], 4294963200  ;;  %v3431_v0 = vld [vmem:[#allocation5 + $0x4] ss:$16 sps:$4 sm:$0xff]   ;;  %v3433_v1 = vld [vmem:[#allocation5 + $0xc] ss:$16 sps:$4 sm:$0xff]  }
  0x4b   :  { %1311 = vmatprep.subr.bf16.mxu0 %v3431_v0  ;;  %v3435_v2 = vld [vmem:[#allocation5] ss:$16 sps:$4 sm:$0xff]   ;;  %v3436_v3 = vld [vmem:[#allocation5 + $0x8] ss:$16 sps:$4 sm:$0xff]   ;;  %1475 = vmatprep.subr.bf16.mxu1 %v3433_v1  ;;  %v3437_v4 = vld [vmem:[#allocation5 + $0x24] ss:$16 sps:$4 sm:$0xff]  }
  0x4c   :  { %1312 = vmatpush1.bf16.msra.mxu0 %v3435_v2  ;;  %1476 = vmatpush1.bf16.msra.mxu1 %v3436_v3  ;;  %v3439_v5 = vld [vmem:[#allocation5 + $0x2c] ss:$16 sps:$4 sm:$0xff]   ;;  %v3441_v6 = vld [vmem:[#allocation5 + $0x20] ss:$16 sps:$4 sm:$0xff]   ;;  %v3442_v7 = vld [vmem:[#allocation5 + $0x28] ss:$16 sps:$4 sm:$0xff]  }
  0x4d   :  { %1313 = vmatprep.subr.bf16.mxu0 %v3437_v4  ;;  %1477 = vmatprep.subr.bf16.mxu1 %v3439_v5  ;;  %v3443_v8 = vld [vmem:[#allocation5 + $0x44] ss:$16 sps:$4 sm:$0xff]   ;;  %v3445_v9 = vld [vmem:[#allocation5 + $0x4c] ss:$16 sps:$4 sm:$0xff]   ;;  %v3447_v10 = vld [vmem:[#allocation5 + $0x40] ss:$16 sps:$4 sm:$0xff]  }
  0x4e   :  { %v3448_v11 = vld [vmem:[#allocation5 + $0x48] ss:$16 sps:$4 sm:$0xff]   ;;  %v3449_v12 = vld [vmem:[#allocation5 + $0x64] ss:$16 sps:$4 sm:$0xff]   ;;  %v3451_v13 = vld [vmem:[#allocation5 + $0x6c] ss:$16 sps:$4 sm:$0xff]  }
  0x4f   :  { %v3453_v14 = vld [vmem:[#allocation5 + $0x60] ss:$16 sps:$4 sm:$0xff]   ;;  %v3454_v15 = vld [vmem:[#allocation5 + $0x68] ss:$16 sps:$4 sm:$0xff]   ;;  %v3455_v16 = vld [vmem:[#allocation5 + $0x84] ss:$16 sps:$4 sm:$0xff]  }
  0x50   :  { %1314 = vmatpush1.bf16.msra.mxu0 %v3441_v6  ;;  %1478 = vmatpush1.bf16.msra.mxu1 %v3442_v7  ;;  %v3457_v17 = vld [vmem:[#allocation5 + $0x8c] ss:$16 sps:$4 sm:$0xff]   ;;  %v3459_v18 = vld [vmem:[#allocation5 + $0x80] ss:$16 sps:$4 sm:$0xff]   ;;  %v3460_v19 = vld [vmem:[#allocation5 + $0x88] ss:$16 sps:$4 sm:$0xff]  }
  0x51   :  { %1315 = vmatprep.subr.bf16.mxu0 %v3443_v8  ;;  %1479 = vmatprep.subr.bf16.mxu1 %v3445_v9  ;;  %v3461_v20 = vld [vmem:[#allocation5 + $0xa4] ss:$16 sps:$4 sm:$0xff]   ;;  %v3463_v21 = vld [vmem:[#allocation5 + $0xac] ss:$16 sps:$4 sm:$0xff]   ;;  %v3465_v22 = vld [vmem:[#allocation5 + $0xa0] ss:$16 sps:$4 sm:$0xff]  }
  0x52   :  { %v3466_v23 = vld [vmem:[#allocation5 + $0xa8] ss:$16 sps:$4 sm:$0xff]   ;;  %v3467_v24 = vld [vmem:[#allocation5 + $0xc4] ss:$16 sps:$4 sm:$0xff]   ;;  %v3469_v25 = vld [vmem:[#allocation5 + $0xcc] ss:$16 sps:$4 sm:$0xff]  }
  0x53   :  { %v3471_v26 = vld [vmem:[#allocation5 + $0xc0] ss:$16 sps:$4 sm:$0xff]   ;;  %v3472_v27 = vld [vmem:[#allocation5 + $0xc8] ss:$16 sps:$4 sm:$0xff]   ;;  %v3473_v28 = vld [vmem:[#allocation5 + $0xe4] ss:$16 sps:$4 sm:$0xff]  }
  0x54   :  { %1316 = vmatpush1.bf16.msra.mxu0 %v3447_v10  ;;  %1480 = vmatpush1.bf16.msra.mxu1 %v3448_v11  ;;  %v3475_v29 = vld [vmem:[#allocation5 + $0xec] ss:$16 sps:$4 sm:$0xff]   ;;  %v3477_v30 = vld [vmem:[#allocation5 + $0xe0] ss:$16 sps:$4 sm:$0xff]   ;;  %v3478_v31 = vld [vmem:[#allocation5 + $0xe8] ss:$16 sps:$4 sm:$0xff]  }
  0x55   :  { %1317 = vmatprep.subr.bf16.mxu0 %v3449_v12  ;;  %1481 = vmatprep.subr.bf16.mxu1 %v3451_v13  ;;  %v3479_v32 = vld [vmem:[#allocation5 + $0x104] ss:$16 sps:$4 sm:$0xff]   ;;  %v3481_v33 = vld [vmem:[#allocation5 + $0x10c] ss:$16 sps:$4 sm:$0xff]   ;;  %v3483_v34 = vld [vmem:[#allocation5 + $0x100] ss:$16 sps:$4 sm:$0xff]  }
  0x56   :  { %v3484_v35 = vld [vmem:[#allocation5 + $0x108] ss:$16 sps:$4 sm:$0xff]   ;;  %v3485_v36 = vld [vmem:[#allocation5 + $0x124] ss:$16 sps:$4 sm:$0xff]   ;;  %v3487_v37 = vld [vmem:[#allocation5 + $0x12c] ss:$16 sps:$4 sm:$0xff]  }
  0x57   :  { %v3489_v38 = vld [vmem:[#allocation5 + $0x120] ss:$16 sps:$4 sm:$0xff]   ;;  %v3490_v39 = vld [vmem:[#allocation5 + $0x128] ss:$16 sps:$4 sm:$0xff]   ;;  %v3491_v40 = vld [vmem:[#allocation5 + $0x144] ss:$16 sps:$4 sm:$0xff]  }
  0x58   :  { %1318 = vmatpush1.bf16.msra.mxu0 %v3453_v14  ;;  %1482 = vmatpush1.bf16.msra.mxu1 %v3454_v15  ;;  %v3493_v41 = vld [vmem:[#allocation5 + $0x14c] ss:$16 sps:$4 sm:$0xff]   ;;  %v3495_v42 = vld [vmem:[#allocation5 + $0x140] ss:$16 sps:$4 sm:$0xff]   ;;  %v3496_v43 = vld [vmem:[#allocation5 + $0x148] ss:$16 sps:$4 sm:$0xff]  }
  0x59   :  { %1319 = vmatprep.subr.bf16.mxu0 %v3455_v16  ;;  %1483 = vmatprep.subr.bf16.mxu1 %v3457_v17  ;;  %v3497_v44 = vld [vmem:[#allocation5 + $0x164] ss:$16 sps:$4 sm:$0xff]   ;;  %v3499_v45 = vld [vmem:[#allocation5 + $0x16c] ss:$16 sps:$4 sm:$0xff]   ;;  %v3501_v47 = vld [vmem:[#allocation5 + $0x160] ss:$16 sps:$4 sm:$0xff]  }
  0x5a   :  { %v81_v46 = vld [vmem:[#allocation2] sm:$0xff]  ;;  %v3505_v51 = vld [vmem:[#allocation5 + $0x18c] ss:$16 sps:$4 sm:$0xff]   ;;  %v3507_v52 = vld [vmem:[#allocation5 + $0x180] ss:$16 sps:$4 sm:$0xff]   ;;  %vm1307_vm0 = vcmask 130048  }
  0x5b   :  { %v2972_v48 = vcombine.high %v81_v46, %v81_v46  ;;  %v3502_v49 = vld [vmem:[#allocation5 + $0x168] ss:$16 sps:$4 sm:$0xff]   ;;  %v3503_v50 = vld [vmem:[#allocation5 + $0x184] ss:$16 sps:$4 sm:$0xff]   ;;  %v3511_v55 = vld [vmem:[#allocation5 + $0x1ac] ss:$16 sps:$4 sm:$0xff]   ;;  %v2971_v4 = vcombine.low %v81_v46, %v81_v46 }
  0x5c   :  { %1320 = vmatpush1.bf16.msra.mxu0 %v3459_v18  ;;  %1484 = vmatpush1.bf16.msra.mxu1 %v3460_v19  ;;  %v3508_v53 = vld [vmem:[#allocation5 + $0x188] ss:$16 sps:$4 sm:$0xff]   ;;  %v3509_v54 = vld [vmem:[#allocation5 + $0x1a4] ss:$16 sps:$4 sm:$0xff]   ;;  %v3513_v56 = vld [vmem:[#allocation5 + $0x1a0] ss:$16 sps:$4 sm:$0xff]  }
  0x5d   :  { %1321 = vmatprep.subr.bf16.mxu0 %v3461_v20  ;;  %1485 = vmatprep.subr.bf16.mxu1 %v3463_v21  ;;  %v3514_v57 = vld [vmem:[#allocation5 + $0x1a8] ss:$16 sps:$4 sm:$0xff]   ;;  %v3515_v58 = vld [vmem:[#allocation5 + $0x1c4] ss:$16 sps:$4 sm:$0xff]   ;;  %v3517_v59 = vld [vmem:[#allocation5 + $0x1cc] ss:$16 sps:$4 sm:$0xff]  }
  0x5e   :  { %1343 = vmatprep.mubr.bf16.mxu0 %v2972_v48  ;;  %1507 = vmatprep.mubr.bf16.mxu1 %v2972_v48  ;;  %v3519_v60 = vld [vmem:[#allocation5 + $0x1c0] ss:$16 sps:$4 sm:$0xff]   ;;  %v3520_v61 = vld [vmem:[#allocation5 + $0x1c8] ss:$16 sps:$4 sm:$0xff]   ;;  %v3521_v62 = vld [vmem:[#allocation5 + $0x1e4] ss:$16 sps:$4 sm:$0xff]  }
  0x5f   :  { %v3523_v63 = vld [vmem:[#allocation5 + $0x1ec] ss:$16 sps:$4 sm:$0xff]   ;;  %v3525_v0 = vld [vmem:[#allocation5 + $0x1e0] ss:$16 sps:$4 sm:$0xff]   ;;  %v3526_v1 = vld [vmem:[#allocation5 + $0x1e8] ss:$16 sps:$4 sm:$0xff]  }
  0x60   :  { %1322 = vmatpush1.bf16.msra.mxu0 %v3465_v22  ;;  %1486 = vmatpush1.bf16.msra.mxu1 %v3466_v23  ;;  %v3531_v2 = vld [vmem:[#allocation5 + $0x204] ss:$16 sps:$4 sm:$0xff]   ;;  %v3534_v3 = vld [vmem:[#allocation5 + $0x20c] ss:$16 sps:$4 sm:$0xff]   ;;  %v3529_v5 = vld [vmem:[#allocation5 + $0x200] ss:$16 sps:$4 sm:$0xff]  }
  0x61   :  { %1323 = vmatprep.subr.bf16.mxu0 %v3467_v24  ;;  %1487 = vmatprep.subr.bf16.mxu1 %v3469_v25  ;;  %v3532_v6 = vld [vmem:[#allocation5 + $0x208] ss:$16 sps:$4 sm:$0xff]   ;;  %v3537_v7 = vld [vmem:[#allocation5 + $0x224] ss:$16 sps:$4 sm:$0xff]   ;;  %v3540_v8 = vld [vmem:[#allocation5 + $0x22c] ss:$16 sps:$4 sm:$0xff]  }
  0x62   :  { %v3535_v9 = vld [vmem:[#allocation5 + $0x220] ss:$16 sps:$4 sm:$0xff]   ;;  %v3538_v10 = vld [vmem:[#allocation5 + $0x228] ss:$16 sps:$4 sm:$0xff]   ;;  %v3543_v11 = vld [vmem:[#allocation5 + $0x244] ss:$16 sps:$4 sm:$0xff]  }
  0x63   :  { %v3546_v12 = vld [vmem:[#allocation5 + $0x24c] ss:$16 sps:$4 sm:$0xff]   ;;  %v3541_v13 = vld [vmem:[#allocation5 + $0x240] ss:$16 sps:$4 sm:$0xff]   ;;  %v3544_v14 = vld [vmem:[#allocation5 + $0x248] ss:$16 sps:$4 sm:$0xff]  }
  0x64   :  { %1324 = vmatpush1.bf16.msra.mxu0 %v3471_v26  ;;  %1488 = vmatpush1.bf16.msra.mxu1 %v3472_v27  ;;  %v3549_v15 = vld [vmem:[#allocation5 + $0x264] ss:$16 sps:$4 sm:$0xff]   ;;  %v3552_v16 = vld [vmem:[#allocation5 + $0x26c] ss:$16 sps:$4 sm:$0xff]   ;;  %v3547_v17 = vld [vmem:[#allocation5 + $0x260] ss:$16 sps:$4 sm:$0xff]  }
  0x65   :  { %1325 = vmatprep.subr.bf16.mxu0 %v3473_v28  ;;  %1489 = vmatprep.subr.bf16.mxu1 %v3475_v29  ;;  %v3550_v18 = vld [vmem:[#allocation5 + $0x268] ss:$16 sps:$4 sm:$0xff]   ;;  %v3555_v19 = vld [vmem:[#allocation5 + $0x284] ss:$16 sps:$4 sm:$0xff]   ;;  %v3558_v20 = vld [vmem:[#allocation5 + $0x28c] ss:$16 sps:$4 sm:$0xff]  }
  0x66   :  { %v3553_v21 = vld [vmem:[#allocation5 + $0x280] ss:$16 sps:$4 sm:$0xff]   ;;  %v3556_v22 = vld [vmem:[#allocation5 + $0x288] ss:$16 sps:$4 sm:$0xff]   ;;  %v3561_v23 = vld [vmem:[#allocation5 + $0x2a4] ss:$16 sps:$4 sm:$0xff]  }
  0x67   :  { %v3564_v24 = vld [vmem:[#allocation5 + $0x2ac] ss:$16 sps:$4 sm:$0xff]   ;;  %v3559_v25 = vld [vmem:[#allocation5 + $0x2a0] ss:$16 sps:$4 sm:$0xff]   ;;  %v3562_v26 = vld [vmem:[#allocation5 + $0x2a8] ss:$16 sps:$4 sm:$0xff]  }
  0x68   :  { %1326 = vmatpush1.bf16.msra.mxu0 %v3477_v30  ;;  %1490 = vmatpush1.bf16.msra.mxu1 %v3478_v31  ;;  %v3567_v27 = vld [vmem:[#allocation5 + $0x2c4] ss:$16 sps:$4 sm:$0xff]   ;;  %v3570_v28 = vld [vmem:[#allocation5 + $0x2cc] ss:$16 sps:$4 sm:$0xff]   ;;  %v3565_v31 = vld [vmem:[#allocation5 + $0x2c0] ss:$16 sps:$4 sm:$0xff]  }
  0x69   :  { %1327 = vmatprep.subr.bf16.mxu0 %v3479_v32  ;;  %1491 = vmatprep.subr.bf16.mxu1 %v3481_v33  ;;  %v4178_v29 = vld [vmem:[#allocation2 + $0x8] sm:$0xff]  ;;  %v3568_v32 = vld [vmem:[#allocation5 + $0x2c8] ss:$16 sps:$4 sm:$0xff]   ;;  %v3573_v33 = vld [vmem:[#allocation5 + $0x2e4] ss:$16 sps:$4 sm:$0xff]   ;;  %s4083_s29 = smov [#allocation10]  }
  0x6a   :  { %v2974_v30 = vcombine.high %v4178_v29, %v4178_v29  ;;  %v3594_v46 = vld [vmem:[#allocation5 + $0x34c] ss:$16 sps:$4 sm:$0xff]   ;;  %v3592_v48 = vld [vmem:[#allocation5 + $0x348] ss:$16 sps:$4 sm:$0xff]   ;;  %s2960_s30 = sshll.u32 %s4083_s29, 4  ;;  %s2961_s30 = int_to_ptr.vmem [resolvable:$true] %s2960_s30 }
  0x6b   :  { %s4044_s8 = scalar_lea.vmem %s2961_s30, 64  ;;  %p4049_p5 = scmp.lt.s32.totalorder %s2961_s30, %s2961_s30 }
  0x6c   :  { %1328 = vmatpush1.bf16.msra.mxu0 %v3483_v34  ;;  %1492 = vmatpush1.bf16.msra.mxu1 %v3484_v35  ;;  %v3576_v34 = vld [vmem:[#allocation5 + $0x2ec] ss:$16 sps:$4 sm:$0xff]   ;;  %v3571_v35 = vld [vmem:[#allocation5 + $0x2e0] ss:$16 sps:$4 sm:$0xff]   ;;  %p4045_p4 = scmp.ne.s32.totalorder %s2961_s30, %s4044_s8  ;;  %p4050_p6 = scmp.lt.s32.totalorder %s4044_s8, %s4044_s8 }
  0x6d   :  { %1329 = vmatprep.subr.bf16.mxu0 %v3485_v36  ;;  %1493 = vmatprep.subr.bf16.mxu1 %v3487_v37  ;;  %v3574_v36 = vld [vmem:[#allocation5 + $0x2e8] ss:$16 sps:$4 sm:$0xff]   ;;  %v3579_v37 = vld [vmem:[#allocation5 + $0x304] ss:$16 sps:$4 sm:$0xff]  }
  0x6e   :  { %p4051_p7 = por %p4050_p6, %p4049_p5 }
  0x70   :  { %1330 = vmatpush1.bf16.msra.mxu0 %v3489_v38  ;;  %1494 = vmatpush1.bf16.msra.mxu1 %v3490_v39  ;;  %v3582_v38 = vld [vmem:[#allocation5 + $0x30c] ss:$16 sps:$4 sm:$0xff]   ;;  %v3577_v39 = vld [vmem:[#allocation5 + $0x300] ss:$16 sps:$4 sm:$0xff]   ;;  %p4052_p8 = pnand %p4051_p7, %p4045_p4 }
  0x71   :  { %1331 = vmatprep.subr.bf16.mxu0 %v3491_v40  ;;  %1495 = vmatprep.subr.bf16.mxu1 %v3493_v41  ;;  %v3580_v40 = vld [vmem:[#allocation5 + $0x308] ss:$16 sps:$4 sm:$0xff]   ;;  %v3585_v41 = vld [vmem:[#allocation5 + $0x324] ss:$16 sps:$4 sm:$0xff]  }
  0x74   :  { %1332 = vmatpush1.bf16.msra.mxu0 %v3495_v42  ;;  %1496 = vmatpush1.bf16.msra.mxu1 %v3496_v43  ;;  %v3588_v42 = vld [vmem:[#allocation5 + $0x32c] ss:$16 sps:$4 sm:$0xff]   ;;  %v3583_v43 = vld [vmem:[#allocation5 + $0x320] ss:$16 sps:$4 sm:$0xff]  }
  0x75   :  { %1333 = vmatprep.subr.bf16.mxu0 %v3497_v44  ;;  %1497 = vmatprep.subr.bf16.mxu1 %v3499_v45  ;;  %v3586_v44 = vld [vmem:[#allocation5 + $0x328] ss:$16 sps:$4 sm:$0xff]   ;;  %v3591_v45 = vld [vmem:[#allocation5 + $0x344] ss:$16 sps:$4 sm:$0xff]  }
  0x78   :  { %1334 = vmatpush1.bf16.msra.mxu0 %v3501_v47  ;;  %1498 = vmatpush1.bf16.msra.mxu1 %v3502_v49  ;;  %v3589_v47 = vld [vmem:[#allocation5 + $0x340] ss:$16 sps:$4 sm:$0xff]   ;;  %v3597_v49 = vld [vmem:[#allocation5 + $0x364] ss:$16 sps:$4 sm:$0xff]  }
  0x79   :  { %1335 = vmatprep.subr.bf16.mxu0 %v3503_v50  ;;  %1499 = vmatprep.subr.bf16.mxu1 %v3505_v51  ;;  %v3600_v50 = vld [vmem:[#allocation5 + $0x36c] ss:$16 sps:$4 sm:$0xff]   ;;  %v3595_v51 = vld [vmem:[#allocation5 + $0x360] ss:$16 sps:$4 sm:$0xff]  }
  0x7c   :  { %1336 = vmatpush1.bf16.msra.mxu0 %v3507_v52  ;;  %1500 = vmatpush1.bf16.msra.mxu1 %v3508_v53  ;;  %v3598_v52 = vld [vmem:[#allocation5 + $0x368] ss:$16 sps:$4 sm:$0xff]   ;;  %v3603_v53 = vld [vmem:[#allocation5 + $0x384] ss:$16 sps:$4 sm:$0xff]  }
  0x7d   :  { %1337 = vmatprep.subr.bf16.mxu0 %v3509_v54  ;;  %1501 = vmatprep.subr.bf16.mxu1 %v3511_v55  ;;  %v3606_v54 = vld [vmem:[#allocation5 + $0x38c] ss:$16 sps:$4 sm:$0xff]   ;;  %v3601_v55 = vld [vmem:[#allocation5 + $0x380] ss:$16 sps:$4 sm:$0xff]  }
  0x80   :  { %1338 = vmatpush1.bf16.msra.mxu0 %v3513_v56  ;;  %1502 = vmatpush1.bf16.msra.mxu1 %v3514_v57  ;;  %v3604_v56 = vld [vmem:[#allocation5 + $0x388] ss:$16 sps:$4 sm:$0xff]   ;;  %v3609_v57 = vld [vmem:[#allocation5 + $0x3a4] ss:$16 sps:$4 sm:$0xff]  }
  0x81   :  { %1339 = vmatprep.subr.bf16.mxu0 %v3515_v58  ;;  %1503 = vmatprep.subr.bf16.mxu1 %v3517_v59  ;;  %v3612_v58 = vld [vmem:[#allocation5 + $0x3ac] ss:$16 sps:$4 sm:$0xff]   ;;  %v3607_v59 = vld [vmem:[#allocation5 + $0x3a0] ss:$16 sps:$4 sm:$0xff]  }
  0x84   :  { %1340 = vmatpush1.bf16.msra.mxu0 %v3519_v60  ;;  %1504 = vmatpush1.bf16.msra.mxu1 %v3520_v61  ;;  %v3610_v60 = vld [vmem:[#allocation5 + $0x3a8] ss:$16 sps:$4 sm:$0xff]   ;;  %v3615_v61 = vld [vmem:[#allocation5 + $0x3c4] ss:$16 sps:$4 sm:$0xff]  }
  0x85   :  { %1341 = vmatprep.subr.bf16.mxu0 %v3521_v62  ;;  %1505 = vmatprep.subr.bf16.mxu1 %v3523_v63  ;;  %v3618_v62 = vld [vmem:[#allocation5 + $0x3cc] ss:$16 sps:$4 sm:$0xff]   ;;  %v3613_v63 = vld [vmem:[#allocation5 + $0x3c0] ss:$16 sps:$4 sm:$0xff]  }
  0x88   :  { %1342 = vmatpush1.bf16.msra.mxu0 %v3525_v0  ;;  %1506 = vmatpush1.bf16.msra.mxu1 %v3526_v1  ;;  %v3616_v0 = vld [vmem:[#allocation5 + $0x3c8] ss:$16 sps:$4 sm:$0xff]   ;;  %v3621_v1 = vld [vmem:[#allocation5 + $0x3e4] ss:$16 sps:$4 sm:$0xff]  }
  0x89   :  { %1352 = vmatprep.subr.bf16.mxu0 %v3531_v2  ;;  %1516 = vmatprep.subr.bf16.mxu1 %v3534_v3  ;;  %v3624_v2 = vld [vmem:[#allocation5 + $0x3ec] ss:$16 sps:$4 sm:$0xff]   ;;  %v3619_v3 = vld [vmem:[#allocation5 + $0x3e0] ss:$16 sps:$4 sm:$0xff]  }
  0x8b   :  { %1344 = vmatmul.mubr.bf16.vlgmr.msra.gmra.mrb[0].mxu0 %v2971_v4  ;;  %1508 = vmatmul.mubr.bf16.vlgmr.msra.gmra.mrb[0].mxu1 %v2971_v4  ;;  %v3622_v4 = vld [vmem:[#allocation5 + $0x3e8] ss:$16 sps:$4 sm:$0xff]  }
  0x8c   :  { %1353 = vmatpush1.bf16.msra.mxu0 %v3529_v5  ;;  %1517 = vmatpush1.bf16.msra.mxu1 %v3532_v6  ;;  %v3629_v5 = vld [vmem:[#allocation5 + $0x404] ss:$16 sps:$4 sm:$0xff]   ;;  %v3632_v6 = vld [vmem:[#allocation5 + $0x40c] ss:$16 sps:$4 sm:$0xff]  }
  0x8d   :  { %1354 = vmatprep.subr.bf16.mxu0 %v3537_v7  ;;  %1518 = vmatprep.subr.bf16.mxu1 %v3540_v8  ;;  %v2973_v7 = vcombine.low %v4178_v29, %v4178_v29  ;;  %v3627_v8 = vld [vmem:[#allocation5 + $0x400] ss:$16 sps:$4 sm:$0xff]   ;;  %v3662_v29 = vld [vmem:[#allocation5 + $0x4ac] ss:$16 sps:$4 sm:$0xff]  }
  0x8e   :  { %1384 = vmatprep.mubr.bf16.mxu0 %v2974_v30  ;;  %1548 = vmatprep.mubr.bf16.mxu1 %v2974_v30  ;;  %v3657_v30 = vld [vmem:[#allocation5 + $0x4a0] ss:$16 sps:$4 sm:$0xff]  }
  0x90   :  { %1355 = vmatpush1.bf16.msra.mxu0 %v3535_v9  ;;  %1519 = vmatpush1.bf16.msra.mxu1 %v3538_v10  ;;  %v3630_v9 = vld [vmem:[#allocation5 + $0x408] ss:$16 sps:$4 sm:$0xff]   ;;  %v3635_v10 = vld [vmem:[#allocation5 + $0x424] ss:$16 sps:$4 sm:$0xff]  }
  0x91   :  { %1356 = vmatprep.subr.bf16.mxu0 %v3543_v11  ;;  %1520 = vmatprep.subr.bf16.mxu1 %v3546_v12  ;;  %v4184_v11 = vld [vmem:[#allocation2 + $0x10] sm:$0xff]  ;;  %v3638_v12 = vld [vmem:[#allocation5 + $0x42c] ss:$16 sps:$4 sm:$0xff]  }
  0x94   :  { %1357 = vmatpush1.bf16.msra.mxu0 %v3541_v13  ;;  %1521 = vmatpush1.bf16.msra.mxu1 %v3544_v14  ;;  %v2976_v13 = vcombine.high %v4184_v11, %v4184_v11  ;;  %v3633_v14 = vld [vmem:[#allocation5 + $0x420] ss:$16 sps:$4 sm:$0xff]  }
  0x95   :  { %1358 = vmatprep.subr.bf16.mxu0 %v3549_v15  ;;  %1522 = vmatprep.subr.bf16.mxu1 %v3552_v16  ;;  %v3636_v15 = vld [vmem:[#allocation5 + $0x428] ss:$16 sps:$4 sm:$0xff]   ;;  %v3641_v16 = vld [vmem:[#allocation5 + $0x444] ss:$16 sps:$4 sm:$0xff]  }
  0x98   :  { %1359 = vmatpush1.bf16.msra.mxu0 %v3547_v17  ;;  %1523 = vmatpush1.bf16.msra.mxu1 %v3550_v18  ;;  %v3644_v17 = vld [vmem:[#allocation5 + $0x44c] ss:$16 sps:$4 sm:$0xff]   ;;  %v3639_v18 = vld [vmem:[#allocation5 + $0x440] ss:$16 sps:$4 sm:$0xff]  }
  0x99   :  { %1360 = vmatprep.subr.bf16.mxu0 %v3555_v19  ;;  %1524 = vmatprep.subr.bf16.mxu1 %v3558_v20  ;;  %v3642_v19 = vld [vmem:[#allocation5 + $0x448] ss:$16 sps:$4 sm:$0xff]   ;;  %v3647_v20 = vld [vmem:[#allocation5 + $0x464] ss:$16 sps:$4 sm:$0xff]  }
  0x9c   :  { %1361 = vmatpush1.bf16.msra.mxu0 %v3553_v21  ;;  %1525 = vmatpush1.bf16.msra.mxu1 %v3556_v22  ;;  %v3650_v21 = vld [vmem:[#allocation5 + $0x46c] ss:$16 sps:$4 sm:$0xff]   ;;  %v3645_v22 = vld [vmem:[#allocation5 + $0x460] ss:$16 sps:$4 sm:$0xff]  }
  0x9d   :  { %1362 = vmatprep.subr.bf16.mxu0 %v3561_v23  ;;  %1526 = vmatprep.subr.bf16.mxu1 %v3564_v24  ;;  %v3648_v23 = vld [vmem:[#allocation5 + $0x468] ss:$16 sps:$4 sm:$0xff]   ;;  %v3653_v24 = vld [vmem:[#allocation5 + $0x484] ss:$16 sps:$4 sm:$0xff]  }
  0xa0   :  { %1363 = vmatpush1.bf16.msra.mxu0 %v3559_v25  ;;  %1527 = vmatpush1.bf16.msra.mxu1 %v3562_v26  ;;  %v3656_v25 = vld [vmem:[#allocation5 + $0x48c] ss:$16 sps:$4 sm:$0xff]   ;;  %v3651_v26 = vld [vmem:[#allocation5 + $0x480] ss:$16 sps:$4 sm:$0xff]  }
  0xa1   :  { %1364 = vmatprep.subr.bf16.mxu0 %v3567_v27  ;;  %1528 = vmatprep.subr.bf16.mxu1 %v3570_v28  ;;  %v3654_v27 = vld [vmem:[#allocation5 + $0x488] ss:$16 sps:$4 sm:$0xff]   ;;  %v3659_v28 = vld [vmem:[#allocation5 + $0x4a4] ss:$16 sps:$4 sm:$0xff]  }
  0xa4   :  { %1365 = vmatpush1.bf16.msra.mxu0 %v3565_v31  ;;  %1529 = vmatpush1.bf16.msra.mxu1 %v3568_v32  ;;  %v3660_v31 = vld [vmem:[#allocation5 + $0x4a8] ss:$16 sps:$4 sm:$0xff]   ;;  %v3665_v32 = vld [vmem:[#allocation5 + $0x4c4] ss:$16 sps:$4 sm:$0xff]  }
  0xa5   :  { %1366 = vmatprep.subr.bf16.mxu0 %v3573_v33  ;;  %1530 = vmatprep.subr.bf16.mxu1 %v3576_v34  ;;  %v3668_v33 = vld [vmem:[#allocation5 + $0x4cc] ss:$16 sps:$4 sm:$0xff]   ;;  %v3663_v34 = vld [vmem:[#allocation5 + $0x4c0] ss:$16 sps:$4 sm:$0xff]  }
  0xa8   :  { %1367 = vmatpush1.bf16.msra.mxu0 %v3571_v35  ;;  %1531 = vmatpush1.bf16.msra.mxu1 %v3574_v36  ;;  %v3666_v35 = vld [vmem:[#allocation5 + $0x4c8] ss:$16 sps:$4 sm:$0xff]   ;;  %v3671_v36 = vld [vmem:[#allocation5 + $0x4e4] ss:$16 sps:$4 sm:$0xff]  }
  0xa9   :  { %1368 = vmatprep.subr.bf16.mxu0 %v3579_v37  ;;  %1532 = vmatprep.subr.bf16.mxu1 %v3582_v38  ;;  %v3674_v37 = vld [vmem:[#allocation5 + $0x4ec] ss:$16 sps:$4 sm:$0xff]   ;;  %v3669_v38 = vld [vmem:[#allocation5 + $0x4e0] ss:$16 sps:$4 sm:$0xff]  }
  0xac   :  { %1369 = vmatpush1.bf16.msra.mxu0 %v3577_v39  ;;  %1533 = vmatpush1.bf16.msra.mxu1 %v3580_v40  ;;  %v3672_v39 = vld [vmem:[#allocation5 + $0x4e8] ss:$16 sps:$4 sm:$0xff]   ;;  %v3677_v40 = vld [vmem:[#allocation5 + $0x504] ss:$16 sps:$4 sm:$0xff]  }
  0xad   :  { %1370 = vmatprep.subr.bf16.mxu0 %v3585_v41  ;;  %1534 = vmatprep.subr.bf16.mxu1 %v3588_v42  ;;  %v3680_v41 = vld [vmem:[#allocation5 + $0x50c] ss:$16 sps:$4 sm:$0xff]   ;;  %v3675_v42 = vld [vmem:[#allocation5 + $0x500] ss:$16 sps:$4 sm:$0xff]  }
  0xb0   :  { %1371 = vmatpush1.bf16.msra.mxu0 %v3583_v43  ;;  %1535 = vmatpush1.bf16.msra.mxu1 %v3586_v44  ;;  %v3678_v43 = vld [vmem:[#allocation5 + $0x508] ss:$16 sps:$4 sm:$0xff]   ;;  %v3683_v44 = vld [vmem:[#allocation5 + $0x524] ss:$16 sps:$4 sm:$0xff]  }
  0xb1   :  { %1372 = vmatprep.subr.bf16.mxu0 %v3591_v45  ;;  %1536 = vmatprep.subr.bf16.mxu1 %v3594_v46  ;;  %v3686_v45 = vld [vmem:[#allocation5 + $0x52c] ss:$16 sps:$4 sm:$0xff]   ;;  %v3681_v46 = vld [vmem:[#allocation5 + $0x520] ss:$16 sps:$4 sm:$0xff]  }
  0xb4   :  { %1373 = vmatpush1.bf16.msra.mxu0 %v3589_v47  ;;  %1537 = vmatpush1.bf16.msra.mxu1 %v3592_v48  ;;  %v3684_v47 = vld [vmem:[#allocation5 + $0x528] ss:$16 sps:$4 sm:$0xff]   ;;  %v3689_v48 = vld [vmem:[#allocation5 + $0x544] ss:$16 sps:$4 sm:$0xff]  }
  0xb5   :  { %1374 = vmatprep.subr.bf16.mxu0 %v3597_v49  ;;  %1538 = vmatprep.subr.bf16.mxu1 %v3600_v50  ;;  %v3692_v49 = vld [vmem:[#allocation5 + $0x54c] ss:$16 sps:$4 sm:$0xff]   ;;  %v3687_v50 = vld [vmem:[#allocation5 + $0x540] ss:$16 sps:$4 sm:$0xff]  }
  0xb8   :  { %1375 = vmatpush1.bf16.msra.mxu0 %v3595_v51  ;;  %1539 = vmatpush1.bf16.msra.mxu1 %v3598_v52  ;;  %v3690_v51 = vld [vmem:[#allocation5 + $0x548] ss:$16 sps:$4 sm:$0xff]   ;;  %v3695_v52 = vld [vmem:[#allocation5 + $0x564] ss:$16 sps:$4 sm:$0xff]  }
  0xb9   :  { %1376 = vmatprep.subr.bf16.mxu0 %v3603_v53  ;;  %1540 = vmatprep.subr.bf16.mxu1 %v3606_v54  ;;  %v3698_v53 = vld [vmem:[#allocation5 + $0x56c] ss:$16 sps:$4 sm:$0xff]   ;;  %v3693_v54 = vld [vmem:[#allocation5 + $0x560] ss:$16 sps:$4 sm:$0xff]  }
  0xbc   :  { %1377 = vmatpush1.bf16.msra.mxu0 %v3601_v55  ;;  %1541 = vmatpush1.bf16.msra.mxu1 %v3604_v56  ;;  %v3696_v55 = vld [vmem:[#allocation5 + $0x568] ss:$16 sps:$4 sm:$0xff]   ;;  %v3701_v56 = vld [vmem:[#allocation5 + $0x584] ss:$16 sps:$4 sm:$0xff]  }
  0xbd   :  { %1378 = vmatprep.subr.bf16.mxu0 %v3609_v57  ;;  %1542 = vmatprep.subr.bf16.mxu1 %v3612_v58  ;;  %v3704_v57 = vld [vmem:[#allocation5 + $0x58c] ss:$16 sps:$4 sm:$0xff]   ;;  %v3699_v58 = vld [vmem:[#allocation5 + $0x580] ss:$16 sps:$4 sm:$0xff]  }
  0xc0   :  { %1379 = vmatpush1.bf16.msra.mxu0 %v3607_v59  ;;  %1543 = vmatpush1.bf16.msra.mxu1 %v3610_v60  ;;  %v3702_v59 = vld [vmem:[#allocation5 + $0x588] ss:$16 sps:$4 sm:$0xff]   ;;  %v3707_v60 = vld [vmem:[#allocation5 + $0x5a4] ss:$16 sps:$4 sm:$0xff]  }
  0xc1   :  { %1380 = vmatprep.subr.bf16.mxu0 %v3615_v61  ;;  %1544 = vmatprep.subr.bf16.mxu1 %v3618_v62  ;;  %v3710_v61 = vld [vmem:[#allocation5 + $0x5ac] ss:$16 sps:$4 sm:$0xff]   ;;  %v3705_v62 = vld [vmem:[#allocation5 + $0x5a0] ss:$16 sps:$4 sm:$0xff]  }
  0xc4   :  { %1381 = vmatpush1.bf16.msra.mxu0 %v3613_v63  ;;  %1545 = vmatpush1.bf16.msra.mxu1 %v3616_v0  ;;  %v3708_v63 = vld [vmem:[#allocation5 + $0x5a8] ss:$16 sps:$4 sm:$0xff]   ;;  %v3713_v0 = vld [vmem:[#allocation5 + $0x5c4] ss:$16 sps:$4 sm:$0xff]  }
  0xc5   :  { %1382 = vmatprep.subr.bf16.mxu0 %v3621_v1  ;;  %1546 = vmatprep.subr.bf16.mxu1 %v3624_v2  ;;  %v3716_v1 = vld [vmem:[#allocation5 + $0x5cc] ss:$16 sps:$4 sm:$0xff]   ;;  %v3711_v2 = vld [vmem:[#allocation5 + $0x5c0] ss:$16 sps:$4 sm:$0xff]  }
  0xc8   :  { %1383 = vmatpush1.bf16.msra.mxu0 %v3619_v3  ;;  %1547 = vmatpush1.bf16.msra.mxu1 %v3622_v4  ;;  %v3714_v3 = vld [vmem:[#allocation5 + $0x5c8] ss:$16 sps:$4 sm:$0xff]   ;;  %v3719_v4 = vld [vmem:[#allocation5 + $0x5e4] ss:$16 sps:$4 sm:$0xff]  }
  0xc9   :  { %1393 = vmatprep.subr.bf16.mxu0 %v3629_v5  ;;  %1557 = vmatprep.subr.bf16.mxu1 %v3632_v6  ;;  %v3722_v5 = vld [vmem:[#allocation5 + $0x5ec] ss:$16 sps:$4 sm:$0xff]   ;;  %v3717_v6 = vld [vmem:[#allocation5 + $0x5e0] ss:$16 sps:$4 sm:$0xff]  }
  0xcb   :  { %1385 = vmatmul.mubr.bf16.vlgmr.msra.gmra.mrb[0].mxu0 %v2973_v7  ;;  %1549 = vmatmul.mubr.bf16.vlgmr.msra.gmra.mrb[0].mxu1 %v2973_v7  ;;  %v3720_v7 = vld [vmem:[#allocation5 + $0x5e8] ss:$16 sps:$4 sm:$0xff]  }
  0xcc   :  { %1394 = vmatpush1.bf16.msra.mxu0 %v3627_v8  ;;  %1558 = vmatpush1.bf16.msra.mxu1 %v3630_v9  ;;  %v3727_v8 = vld [vmem:[#allocation5 + $0x604] ss:$16 sps:$4 sm:$0xff]   ;;  %v3730_v9 = vld [vmem:[#allocation5 + $0x60c] ss:$16 sps:$4 sm:$0xff]  }
  0xcd   :  { %1395 = vmatprep.subr.bf16.mxu0 %v3635_v10  ;;  %1559 = vmatprep.subr.bf16.mxu1 %v3638_v12  ;;  %v3725_v10 = vld [vmem:[#allocation5 + $0x600] ss:$16 sps:$4 sm:$0xff]   ;;  %v3728_v12 = vld [vmem:[#allocation5 + $0x608] ss:$16 sps:$4 sm:$0xff]  }
  0xce   :  { %1425 = vmatprep.mubr.bf16.mxu0 %v2976_v13  ;;  %1589 = vmatprep.mubr.bf16.mxu1 %v2976_v13  ;;  %v2975_v13 = vcombine.low %v4184_v11, %v4184_v11  ;;  %v3740_v11 = vld [vmem:[#allocation7 + $0x24] ss:$16 sps:$4 sm:$0xff]  }
  0xd0   :  { %1396 = vmatpush1.bf16.msra.mxu0 %v3633_v14  ;;  %1560 = vmatpush1.bf16.msra.mxu1 %v3636_v15  ;;  %v3734_v14 = vld [vmem:[#allocation7 + $0x4] ss:$16 sps:$4 sm:$0xff]   ;;  %v3737_v15 = vld [vmem:[#allocation7 + $0xc] ss:$16 sps:$4 sm:$0xff]  }
  0xd1   :  { %1397 = vmatprep.subr.bf16.mxu0 %v3641_v16  ;;  %1561 = vmatprep.subr.bf16.mxu1 %v3644_v17  ;;  %v4082_v16 = vmov 0   ;;  %v3731_v17 = vld [vmem:[#allocation2 + $0x18] ss:$0 sps:$4 sm:$0xff]  }
  0xd4   :  { %1398 = vmatpush1.bf16.msra.mxu0 %v3639_v18  ;;  %1562 = vmatpush1.bf16.msra.mxu1 %v3642_v19  ;;  %v3732_v18 = vld [vmem:[#allocation7] ss:$16 sps:$4 sm:$0xff]   ;;  %v3735_v19 = vld [vmem:[#allocation7 + $0x8] ss:$16 sps:$4 sm:$0xff]  }
  0xd5   :  { %1399 = vmatprep.subr.bf16.mxu0 %v3647_v20  ;;  %1563 = vmatprep.subr.bf16.mxu1 %v3650_v21  ;;  %v3743_v20 = vld [vmem:[#allocation7 + $0x2c] ss:$16 sps:$4 sm:$0xff]   ;;  %v3738_v21 = vld [vmem:[#allocation7 + $0x20] ss:$16 sps:$4 sm:$0xff]  }
  0xd8   :  { %1400 = vmatpush1.bf16.msra.mxu0 %v3645_v22  ;;  %1564 = vmatpush1.bf16.msra.mxu1 %v3648_v23  ;;  %v3741_v22 = vld [vmem:[#allocation7 + $0x28] ss:$16 sps:$4 sm:$0xff]   ;;  %v3746_v23 = vld [vmem:[#allocation7 + $0x44] ss:$16 sps:$4 sm:$0xff]  }
  0xd9   :  { %1401 = vmatprep.subr.bf16.mxu0 %v3653_v24  ;;  %1565 = vmatprep.subr.bf16.mxu1 %v3656_v25  ;;  %v3749_v24 = vld [vmem:[#allocation7 + $0x4c] ss:$16 sps:$4 sm:$0xff]   ;;  %v3744_v25 = vld [vmem:[#allocation7 + $0x40] ss:$16 sps:$4 sm:$0xff]  }
  0xdc   :  { %1402 = vmatpush1.bf16.msra.mxu0 %v3651_v26  ;;  %1566 = vmatpush1.bf16.msra.mxu1 %v3654_v27  ;;  %v3747_v26 = vld [vmem:[#allocation7 + $0x48] ss:$16 sps:$4 sm:$0xff]   ;;  %v3752_v27 = vld [vmem:[#allocation7 + $0x64] ss:$16 sps:$4 sm:$0xff]  }
  0xdd   :  { %1403 = vmatprep.subr.bf16.mxu0 %v3659_v28  ;;  %1567 = vmatprep.subr.bf16.mxu1 %v3662_v29  ;;  %v3755_v28 = vld [vmem:[#allocation7 + $0x6c] ss:$16 sps:$4 sm:$0xff]   ;;  %v3750_v29 = vld [vmem:[#allocation7 + $0x60] ss:$16 sps:$4 sm:$0xff]  }
  0xe0   :  { %1404 = vmatpush1.bf16.msra.mxu0 %v3657_v30  ;;  %1568 = vmatpush1.bf16.msra.mxu1 %v3660_v31  ;;  %v3753_v30 = vld [vmem:[#allocation7 + $0x68] ss:$16 sps:$4 sm:$0xff]   ;;  %v3758_v31 = vld [vmem:[#allocation7 + $0x84] ss:$16 sps:$4 sm:$0xff]  }
  0xe1   :  { %1405 = vmatprep.subr.bf16.mxu0 %v3665_v32  ;;  %1569 = vmatprep.subr.bf16.mxu1 %v3668_v33  ;;  %v3761_v32 = vld [vmem:[#allocation7 + $0x8c] ss:$16 sps:$4 sm:$0xff]   ;;  %v3756_v33 = vld [vmem:[#allocation7 + $0x80] ss:$16 sps:$4 sm:$0xff]  }
  0xe4   :  { %1406 = vmatpush1.bf16.msra.mxu0 %v3663_v34  ;;  %1570 = vmatpush1.bf16.msra.mxu1 %v3666_v35  ;;  %v3759_v34 = vld [vmem:[#allocation7 + $0x88] ss:$16 sps:$4 sm:$0xff]   ;;  %v3764_v35 = vld [vmem:[#allocation7 + $0xa4] ss:$16 sps:$4 sm:$0xff]  }
  0xe5   :  { %1407 = vmatprep.subr.bf16.mxu0 %v3671_v36  ;;  %1571 = vmatprep.subr.bf16.mxu1 %v3674_v37  ;;  %v3767_v36 = vld [vmem:[#allocation7 + $0xac] ss:$16 sps:$4 sm:$0xff]   ;;  %v3762_v37 = vld [vmem:[#allocation7 + $0xa0] ss:$16 sps:$4 sm:$0xff]  }
  0xe8   :  { %1408 = vmatpush1.bf16.msra.mxu0 %v3669_v38  ;;  %1572 = vmatpush1.bf16.msra.mxu1 %v3672_v39  ;;  %v3765_v38 = vld [vmem:[#allocation7 + $0xa8] ss:$16 sps:$4 sm:$0xff]   ;;  %v3770_v39 = vld [vmem:[#allocation7 + $0xc4] ss:$16 sps:$4 sm:$0xff]  }
  0xe9   :  { %1409 = vmatprep.subr.bf16.mxu0 %v3677_v40  ;;  %1573 = vmatprep.subr.bf16.mxu1 %v3680_v41  ;;  %v3773_v40 = vld [vmem:[#allocation7 + $0xcc] ss:$16 sps:$4 sm:$0xff]   ;;  %v3768_v41 = vld [vmem:[#allocation7 + $0xc0] ss:$16 sps:$4 sm:$0xff]  }
  0xec   :  { %1410 = vmatpush1.bf16.msra.mxu0 %v3675_v42  ;;  %1574 = vmatpush1.bf16.msra.mxu1 %v3678_v43  ;;  %v3771_v42 = vld [vmem:[#allocation7 + $0xc8] ss:$16 sps:$4 sm:$0xff]   ;;  %v3776_v43 = vld [vmem:[#allocation7 + $0xe4] ss:$16 sps:$4 sm:$0xff]  }
  0xed   :  { %1411 = vmatprep.subr.bf16.mxu0 %v3683_v44  ;;  %1575 = vmatprep.subr.bf16.mxu1 %v3686_v45  ;;  %v3779_v44 = vld [vmem:[#allocation7 + $0xec] ss:$16 sps:$4 sm:$0xff]   ;;  %v3774_v45 = vld [vmem:[#allocation7 + $0xe0] ss:$16 sps:$4 sm:$0xff]  }
  0xf0   :  { %1412 = vmatpush1.bf16.msra.mxu0 %v3681_v46  ;;  %1576 = vmatpush1.bf16.msra.mxu1 %v3684_v47  ;;  %v3777_v46 = vld [vmem:[#allocation7 + $0xe8] ss:$16 sps:$4 sm:$0xff]   ;;  %v3782_v47 = vld [vmem:[#allocation7 + $0x104] ss:$16 sps:$4 sm:$0xff]  }
  0xf1   :  { %1413 = vmatprep.subr.bf16.mxu0 %v3689_v48  ;;  %1577 = vmatprep.subr.bf16.mxu1 %v3692_v49  ;;  %v3785_v48 = vld [vmem:[#allocation7 + $0x10c] ss:$16 sps:$4 sm:$0xff]   ;;  %v3780_v49 = vld [vmem:[#allocation7 + $0x100] ss:$16 sps:$4 sm:$0xff]  }
  0xf4   :  { %1414 = vmatpush1.bf16.msra.mxu0 %v3687_v50  ;;  %1578 = vmatpush1.bf16.msra.mxu1 %v3690_v51  ;;  %v3783_v50 = vld [vmem:[#allocation7 + $0x108] ss:$16 sps:$4 sm:$0xff]   ;;  %v3788_v51 = vld [vmem:[#allocation7 + $0x124] ss:$16 sps:$4 sm:$0xff]  }
  0xf5   :  { %1415 = vmatprep.subr.bf16.mxu0 %v3695_v52  ;;  %1579 = vmatprep.subr.bf16.mxu1 %v3698_v53  ;;  %v3791_v52 = vld [vmem:[#allocation7 + $0x12c] ss:$16 sps:$4 sm:$0xff]   ;;  %v3786_v53 = vld [vmem:[#allocation7 + $0x120] ss:$16 sps:$4 sm:$0xff]  }
  0xf8   :  { %1416 = vmatpush1.bf16.msra.mxu0 %v3693_v54  ;;  %1580 = vmatpush1.bf16.msra.mxu1 %v3696_v55  ;;  %v3789_v54 = vld [vmem:[#allocation7 + $0x128] ss:$16 sps:$4 sm:$0xff]   ;;  %v3794_v55 = vld [vmem:[#allocation7 + $0x144] ss:$16 sps:$4 sm:$0xff]  }
  0xf9   :  { %1417 = vmatprep.subr.bf16.mxu0 %v3701_v56  ;;  %1581 = vmatprep.subr.bf16.mxu1 %v3704_v57  ;;  %v3797_v56 = vld [vmem:[#allocation7 + $0x14c] ss:$16 sps:$4 sm:$0xff]   ;;  %v3792_v57 = vld [vmem:[#allocation7 + $0x140] ss:$16 sps:$4 sm:$0xff]  }
  0xfc   :  { %1418 = vmatpush1.bf16.msra.mxu0 %v3699_v58  ;;  %1582 = vmatpush1.bf16.msra.mxu1 %v3702_v59  ;;  %v3795_v58 = vld [vmem:[#allocation7 + $0x148] ss:$16 sps:$4 sm:$0xff]   ;;  %v3800_v59 = vld [vmem:[#allocation7 + $0x164] ss:$16 sps:$4 sm:$0xff]  }
  0xfd   :  { %1419 = vmatprep.subr.bf16.mxu0 %v3707_v60  ;;  %1583 = vmatprep.subr.bf16.mxu1 %v3710_v61  ;;  %v3803_v60 = vld [vmem:[#allocation7 + $0x16c] ss:$16 sps:$4 sm:$0xff]   ;;  %v3798_v61 = vld [vmem:[#allocation7 + $0x160] ss:$16 sps:$4 sm:$0xff]  }
 0x100   :  { %1420 = vmatpush1.bf16.msra.mxu0 %v3705_v62  ;;  %1584 = vmatpush1.bf16.msra.mxu1 %v3708_v63  ;;  %v3801_v62 = vld [vmem:[#allocation7 + $0x168] ss:$16 sps:$4 sm:$0xff]   ;;  %v3806_v63 = vld [vmem:[#allocation7 + $0x184] ss:$16 sps:$4 sm:$0xff]  }
 0x101   :  { %1421 = vmatprep.subr.bf16.mxu0 %v3713_v0  ;;  %1585 = vmatprep.subr.bf16.mxu1 %v3716_v1  ;;  %v3809_v0 = vld [vmem:[#allocation7 + $0x18c] ss:$16 sps:$4 sm:$0xff]   ;;  %v3804_v1 = vld [vmem:[#allocation7 + $0x180] ss:$16 sps:$4 sm:$0xff]  }
 0x104   :  { %1422 = vmatpush1.bf16.msra.mxu0 %v3711_v2  ;;  %1586 = vmatpush1.bf16.msra.mxu1 %v3714_v3  ;;  %v3807_v2 = vld [vmem:[#allocation7 + $0x188] ss:$16 sps:$4 sm:$0xff]   ;;  %v3812_v3 = vld [vmem:[#allocation7 + $0x1a4] ss:$16 sps:$4 sm:$0xff]  }
 0x105   :  { %1423 = vmatprep.subr.bf16.mxu0 %v3719_v4  ;;  %1587 = vmatprep.subr.bf16.mxu1 %v3722_v5  ;;  %v3815_v4 = vld [vmem:[#allocation7 + $0x1ac] ss:$16 sps:$4 sm:$0xff]   ;;  %v3810_v5 = vld [vmem:[#allocation7 + $0x1a0] ss:$16 sps:$4 sm:$0xff]  }
 0x108   :  { %1424 = vmatpush1.bf16.msra.mxu0 %v3717_v6  ;;  %1588 = vmatpush1.bf16.msra.mxu1 %v3720_v7  ;;  %v3813_v6 = vld [vmem:[#allocation7 + $0x1a8] ss:$16 sps:$4 sm:$0xff]   ;;  %v3818_v7 = vld [vmem:[#allocation7 + $0x1c4] ss:$16 sps:$4 sm:$0xff]  }
 0x109   :  { %1434 = vmatprep.subr.bf16.mxu0 %v3727_v8  ;;  %1598 = vmatprep.subr.bf16.mxu1 %v3730_v9  ;;  %v3821_v8 = vld [vmem:[#allocation7 + $0x1cc] ss:$16 sps:$4 sm:$0xff]   ;;  %v3816_v9 = vld [vmem:[#allocation7 + $0x1c0] ss:$16 sps:$4 sm:$0xff]  }
 0x10b   :  { %1426 = vmatmul.mubr.bf16.vlgmr.msra.gmra.mrb[0].mxu0 %v2975_v13  ;;  %1590 = vmatmul.mubr.bf16.vlgmr.msra.gmra.mrb[0].mxu1 %v2975_v13  ;;  %v3827_v13 = vld [vmem:[#allocation7 + $0x1ec] ss:$16 sps:$4 sm:$0xff]  }
 0x10c   :  { %1435 = vmatpush1.bf16.msra.mxu0 %v3725_v10  ;;  %1599 = vmatpush1.bf16.msra.mxu1 %v3728_v12  ;;  %v3819_v10 = vld [vmem:[#allocation7 + $0x1c8] ss:$16 sps:$4 sm:$0xff]   ;;  %v3824_v12 = vld [vmem:[#allocation7 + $0x1e4] ss:$16 sps:$4 sm:$0xff]  }
 0x10d   :  { %1466 = vmatprep.mubr.bf16.mxu0 %v4082_v16  ;;  %1630 = vmatprep.mubr.bf16.mxu1 %v4082_v16  ;;  %v3830_v16 = vld [vmem:[#allocation7 + $0x204] ss:$16 sps:$4 sm:$0xff]  }
 0x10e   :  { %2437 = vmatprep.subr.bf16.mxu0 %v3734_v14  ;;  %2519 = vmatprep.subr.bf16.mxu1 %v3737_v15  ;;  %v3822_v14 = vld [vmem:[#allocation7 + $0x1e0] ss:$16 sps:$4 sm:$0xff]   ;;  %v3825_v15 = vld [vmem:[#allocation7 + $0x1e8] ss:$16 sps:$4 sm:$0xff]  }
 0x117   :  { %3174 = vmatmul.mubr.msk.bf16.vlgmr.msra.gmra.mrb[0].mxu0 %vm1307_vm0, %v3731_v17  ;;  %3175 = vmatmul.mubr.msk.bf16.vlgmr.msra.gmra.mrb[0].mxu1 %vm1307_vm0, %v3731_v17  ;;  %v3833_v17 = vld [vmem:[#allocation7 + $0x20c] ss:$16 sps:$4 sm:$0xff]  }
 0x118   :  { %2438 = vmatpush1.bf16.msra.mxu0 %v3732_v18  ;;  %2520 = vmatpush1.bf16.msra.mxu1 %v3735_v19  ;;  %v283_v18 = vlaneseq }
 0x119   :  { %2439 = vmatprep.subr.bf16.mxu0 %v3740_v11  ;;  %2521 = vmatprep.subr.bf16.mxu1 %v3743_v20  ;;  %v4196_v20 = vld [vmem:[%s4244_s2] sm:$0xf] }
 0x11a   :  { %v4190_v19 = vshrl.u32 %v283_v18, 7  ;;  %v3890_v18 = vld [vmem:[#allocation7 + $0x344] ss:$16 sps:$4 sm:$0xff]  }
 0x11c   :  { %2440 = vmatpush1.bf16.msra.mxu0 %v3738_v21  ;;  %2522 = vmatpush1.bf16.msra.mxu1 %v3741_v22  ;;  %v285_v11 = vsub.s32 0, %v4190_v19  ;;  %v289_v21 = vsub.s32 1, %v4190_v19  ;;  %v297_v22 = vsub.s32 3, %v4190_v19 }
 0x11d   :  { %2441 = vmatprep.subr.bf16.mxu0 %v3746_v23  ;;  %2523 = vmatprep.subr.bf16.mxu1 %v3749_v24 }
 0x11e   :  { %v286_v23 = vrot.slane %v4196_v20, %v285_v11  ;;  %v290_v24 = vrot.slane %v4196_v20, %v289_v21 }
 0x120   :  { %2442 = vmatpush1.bf16.msra.mxu0 %v3744_v25  ;;  %2524 = vmatpush1.bf16.msra.mxu1 %v3747_v26  ;;  %v298_v25 = vrot.slane %v4196_v20, %v297_v22 }
 0x121   :  { %2443 = vmatprep.subr.bf16.mxu0 %v3752_v27  ;;  %2525 = vmatprep.subr.bf16.mxu1 %v3755_v28 }
 0x124   :  { %2444 = vmatpush1.bf16.msra.mxu0 %v3750_v29  ;;  %2526 = vmatpush1.bf16.msra.mxu1 %v3753_v30 }
 0x125   :  { %2445 = vmatprep.subr.bf16.mxu0 %v3758_v31  ;;  %2527 = vmatprep.subr.bf16.mxu1 %v3761_v32 }
 0x128   :  { %2446 = vmatpush1.bf16.msra.mxu0 %v3756_v33  ;;  %2528 = vmatpush1.bf16.msra.mxu1 %v3759_v34 }
 0x129   :  { %2447 = vmatprep.subr.bf16.mxu0 %v3764_v35  ;;  %2529 = vmatprep.subr.bf16.mxu1 %v3767_v36 }
 0x12c   :  { %2448 = vmatpush1.bf16.msra.mxu0 %v3762_v37  ;;  %2530 = vmatpush1.bf16.msra.mxu1 %v3765_v38 }
 0x12d   :  { %2449 = vmatprep.subr.bf16.mxu0 %v3770_v39  ;;  %2531 = vmatprep.subr.bf16.mxu1 %v3773_v40 }
 0x130   :  { %2450 = vmatpush1.bf16.msra.mxu0 %v3768_v41  ;;  %2532 = vmatpush1.bf16.msra.mxu1 %v3771_v42  ;;  %v3828_v41 = vld [vmem:[#allocation7 + $0x200] ss:$16 sps:$4 sm:$0xff]   ;;  %v3831_v42 = vld [vmem:[#allocation7 + $0x208] ss:$16 sps:$4 sm:$0xff]  }
 0x131   :  { %2451 = vmatprep.subr.bf16.mxu0 %v3776_v43  ;;  %2533 = vmatprep.subr.bf16.mxu1 %v3779_v44  ;;  %v3836_v44 = vld [vmem:[#allocation7 + $0x224] ss:$16 sps:$4 sm:$0xff]  }
 0x134   :  { %2452 = vmatpush1.bf16.msra.mxu0 %v3774_v45  ;;  %2534 = vmatpush1.bf16.msra.mxu1 %v3777_v46  ;;  %v3839_v45 = vld [vmem:[#allocation7 + $0x22c] ss:$16 sps:$4 sm:$0xff]  }
 0x135   :  { %2453 = vmatprep.subr.bf16.mxu0 %v3782_v47  ;;  %2535 = vmatprep.subr.bf16.mxu1 %v3785_v48  ;;  %v3834_v47 = vld [vmem:[#allocation7 + $0x220] ss:$16 sps:$4 sm:$0xff]   ;;  %v3837_v48 = vld [vmem:[#allocation7 + $0x228] ss:$16 sps:$4 sm:$0xff]  }
 0x138   :  { %2454 = vmatpush1.bf16.msra.mxu0 %v3780_v49  ;;  %2536 = vmatpush1.bf16.msra.mxu1 %v3783_v50  ;;  %v3842_v49 = vld [vmem:[#allocation7 + $0x244] ss:$16 sps:$4 sm:$0xff]   ;;  %v3845_v50 = vld [vmem:[#allocation7 + $0x24c] ss:$16 sps:$4 sm:$0xff]  }
 0x139   :  { %2455 = vmatprep.subr.bf16.mxu0 %v3788_v51  ;;  %2537 = vmatprep.subr.bf16.mxu1 %v3791_v52  ;;  %v3840_v51 = vld [vmem:[#allocation7 + $0x240] ss:$16 sps:$4 sm:$0xff]   ;;  %v3843_v52 = vld [vmem:[#allocation7 + $0x248] ss:$16 sps:$4 sm:$0xff]  }
 0x13c   :  { %2456 = vmatpush1.bf16.msra.mxu0 %v3786_v53  ;;  %2538 = vmatpush1.bf16.msra.mxu1 %v3789_v54  ;;  %v3848_v53 = vld [vmem:[#allocation7 + $0x264] ss:$16 sps:$4 sm:$0xff]   ;;  %v3851_v54 = vld [vmem:[#allocation7 + $0x26c] ss:$16 sps:$4 sm:$0xff]  }
 0x13d   :  { %2457 = vmatprep.subr.bf16.mxu0 %v3794_v55  ;;  %2539 = vmatprep.subr.bf16.mxu1 %v3797_v56  ;;  %v3846_v55 = vld [vmem:[#allocation7 + $0x260] ss:$16 sps:$4 sm:$0xff]   ;;  %v3849_v56 = vld [vmem:[#allocation7 + $0x268] ss:$16 sps:$4 sm:$0xff]  }
 0x140   :  { %2458 = vmatpush1.bf16.msra.mxu0 %v3792_v57  ;;  %2540 = vmatpush1.bf16.msra.mxu1 %v3795_v58  ;;  %v3854_v57 = vld [vmem:[#allocation7 + $0x284] ss:$16 sps:$4 sm:$0xff]   ;;  %v3857_v58 = vld [vmem:[#allocation7 + $0x28c] ss:$16 sps:$4 sm:$0xff]  }
 0x141   :  { %2459 = vmatprep.subr.bf16.mxu0 %v3800_v59  ;;  %2541 = vmatprep.subr.bf16.mxu1 %v3803_v60  ;;  %v3852_v59 = vld [vmem:[#allocation7 + $0x280] ss:$16 sps:$4 sm:$0xff]   ;;  %v3855_v60 = vld [vmem:[#allocation7 + $0x288] ss:$16 sps:$4 sm:$0xff]  }
 0x144   :  { %2460 = vmatpush1.bf16.msra.mxu0 %v3798_v61  ;;  %2542 = vmatpush1.bf16.msra.mxu1 %v3801_v62  ;;  %v3860_v61 = vld [vmem:[#allocation7 + $0x2a4] ss:$16 sps:$4 sm:$0xff]   ;;  %v3863_v62 = vld [vmem:[#allocation7 + $0x2ac] ss:$16 sps:$4 sm:$0xff]  }
 0x145   :  { %2461 = vmatprep.subr.bf16.mxu0 %v3806_v63  ;;  %2543 = vmatprep.subr.bf16.mxu1 %v3809_v0  ;;  %v3858_v63 = vld [vmem:[#allocation7 + $0x2a0] ss:$16 sps:$4 sm:$0xff]   ;;  %v3861_v0 = vld [vmem:[#allocation7 + $0x2a8] ss:$16 sps:$4 sm:$0xff]  }
 0x148   :  { %2462 = vmatpush1.bf16.msra.mxu0 %v3804_v1  ;;  %2544 = vmatpush1.bf16.msra.mxu1 %v3807_v2  ;;  %v3866_v1 = vld [vmem:[#allocation7 + $0x2c4] ss:$16 sps:$4 sm:$0xff]   ;;  %v3869_v2 = vld [vmem:[#allocation7 + $0x2cc] ss:$16 sps:$4 sm:$0xff]  }
 0x149   :  { %2463 = vmatprep.subr.bf16.mxu0 %v3812_v3  ;;  %2545 = vmatprep.subr.bf16.mxu1 %v3815_v4  ;;  %v3864_v3 = vld [vmem:[#allocation7 + $0x2c0] ss:$16 sps:$4 sm:$0xff]   ;;  %v3867_v4 = vld [vmem:[#allocation7 + $0x2c8] ss:$16 sps:$4 sm:$0xff]  }
 0x14c   :  { %2464 = vmatpush1.bf16.msra.mxu0 %v3810_v5  ;;  %2546 = vmatpush1.bf16.msra.mxu1 %v3813_v6  ;;  %v3872_v5 = vld [vmem:[#allocation7 + $0x2e4] ss:$16 sps:$4 sm:$0xff]   ;;  %v3875_v6 = vld [vmem:[#allocation7 + $0x2ec] ss:$16 sps:$4 sm:$0xff]  }
 0x14d   :  { %2465 = vmatprep.subr.bf16.mxu0 %v3818_v7  ;;  %2547 = vmatprep.subr.bf16.mxu1 %v3821_v8  ;;  %v3870_v7 = vld [vmem:[#allocation7 + $0x2e0] ss:$16 sps:$4 sm:$0xff]   ;;  %v3873_v8 = vld [vmem:[#allocation7 + $0x2e8] ss:$16 sps:$4 sm:$0xff]  }
 0x150   :  { %2466 = vmatpush1.bf16.msra.mxu0 %v3816_v9  ;;  %2548 = vmatpush1.bf16.msra.mxu1 %v3819_v10  ;;  %v3878_v9 = vld [vmem:[#allocation7 + $0x304] ss:$16 sps:$4 sm:$0xff]   ;;  %v3881_v10 = vld [vmem:[#allocation7 + $0x30c] ss:$16 sps:$4 sm:$0xff]  }
 0x151   :  { %2467 = vmatprep.subr.bf16.mxu0 %v3824_v12  ;;  %2549 = vmatprep.subr.bf16.mxu1 %v3827_v13  ;;  %v3876_v12 = vld [vmem:[#allocation7 + $0x300] ss:$16 sps:$4 sm:$0xff]   ;;  %v3879_v13 = vld [vmem:[#allocation7 + $0x308] ss:$16 sps:$4 sm:$0xff]  }
 0x154   :  { %2468 = vmatpush1.bf16.msra.mxu0 %v3822_v14  ;;  %2550 = vmatpush1.bf16.msra.mxu1 %v3825_v15  ;;  %v3884_v14 = vld [vmem:[#allocation7 + $0x324] ss:$16 sps:$4 sm:$0xff]   ;;  %v3887_v15 = vld [vmem:[#allocation7 + $0x32c] ss:$16 sps:$4 sm:$0xff]  }
 0x155   :  { %2478 = vmatprep.subr.bf16.mxu0 %v3830_v16  ;;  %2560 = vmatprep.subr.bf16.mxu1 %v3833_v17  ;;  %v3882_v16 = vld [vmem:[#allocation7 + $0x320] ss:$16 sps:$4 sm:$0xff]   ;;  %v3885_v17 = vld [vmem:[#allocation7 + $0x328] ss:$16 sps:$4 sm:$0xff]  }
 0x1ea   :  { %v1468_v26 = vpop.f32.mrb[0].mxu0  ;;  %v4209_v27 = vpop.f32.mrb[0].mxu1 }
 0x1eb   :  { %v3381_v28 = vadd.f32 %v1468_v26, %v286_v23  ;;  %v1470_v29 = vpop.f32.mrb[1].mxu0  ;;  %v1634_v30 = vpop.f32.mrb[1].mxu1  ;;  %v3893_v23 = vld [vmem:[#allocation7 + $0x34c] ss:$16 sps:$4 sm:$0xff]   ;;  %v3896_v26 = vld [vmem:[#allocation7 + $0x364] ss:$16 sps:$4 sm:$0xff]  }
 0x1ec   :  { %v3382_v31 = vadd.f32 %v1470_v29, %v290_v24  ;;  %v3384_v32 = vadd.f32 %v1634_v30, %v298_v25  ;;  %v1472_v33 = vpop.f32.mrb[2].mxu0  ;;  %v1636_v34 = vpop.f32.mrb[2].mxu1  ;;  %v3888_v24 = vld [vmem:[#allocation7 + $0x340] ss:$16 sps:$4 sm:$0xff]   ;;  %v3891_v25 = vld [vmem:[#allocation7 + $0x348] ss:$16 sps:$4 sm:$0xff]  }
 0x1ed   :  { %v1639_v35 = vmax.f32 %v3381_v28, 0.0  ;;  %v1473_v36 = vpop.f32.mrb[3].mxu0  ;;  %v1637_v37 = vpop.f32.mrb[3].mxu1  ;;  %v3899_v28 = vld [vmem:[#allocation7 + $0x36c] ss:$16 sps:$4 sm:$0xff]  }
 0x1ee   :  { %v1640_v38 = vmax.f32 %v3382_v31, 0.0  ;;  %v1642_v39 = vmax.f32 %v3384_v32, 0.0  ;;  %v3894_v29 = vld [vmem:[#allocation7 + $0x360] ss:$16 sps:$4 sm:$0xff]   ;;  %v3897_v30 = vld [vmem:[#allocation7 + $0x368] ss:$16 sps:$4 sm:$0xff]  }
 0x1ef   :  { %v1643_v43 = vpack.c.bf16 %v1639_v35, %v1639_v35  ;;  %v3902_v31 = vld [vmem:[#allocation7 + $0x384] ss:$16 sps:$4 sm:$0xff]   ;;  %v3905_v32 = vld [vmem:[#allocation7 + $0x38c] ss:$16 sps:$4 sm:$0xff]   ;;  %v3900_v33 = vld [vmem:[#allocation7 + $0x380] ss:$16 sps:$4 sm:$0xff]  }
 0x1f0   :  { %v1644_v40 = vpack.c.bf16 %v1640_v38, %v1640_v38  ;;  %v1646_v46 = vpack.c.bf16 %v1642_v39, %v1642_v39  ;;  %v3903_v34 = vld [vmem:[#allocation7 + $0x388] ss:$16 sps:$4 sm:$0xff]   ;;  %v293_v35 = vsub.s32 2, %v4190_v19  ;;  %v3908_v36 = vld [vmem:[#allocation7 + $0x3a4] ss:$16 sps:$4 sm:$0xff]  }
 0x1f1   :  { %v3911_v37 = vld [vmem:[#allocation7 + $0x3ac] ss:$16 sps:$4 sm:$0xff]   ;;  %v3906_v38 = vld [vmem:[#allocation7 + $0x3a0] ss:$16 sps:$4 sm:$0xff]   ;;  %v3909_v39 = vld [vmem:[#allocation7 + $0x3a8] ss:$16 sps:$4 sm:$0xff]  }
 0x1f2   :  { %2469 = vmatprep.mubr.bf16.mxu0 %v1644_v40  ;;  %2551 = vmatprep.mubr.bf16.mxu1 %v1644_v40  ;;  %v294_v40 = vrot.slane %v4196_v20, %v293_v35  ;;  %v3924_v20 = vld [vmem:[#allocation8 + $0x40] sm:$0xff]  }
 0x1f3   :  { %2470 = vmatmul.mubr.bf16.vlgmr.msra.gmra.mrb[4].mxu0 %v1643_v43  ;;  %2552 = vmatmul.mubr.bf16.vlgmr.msra.gmra.mrb[4].mxu1 %v1643_v43  ;;  %v3912_v43 = vld [vmem:[#allocation7 + $0x3c0] ss:$16 sps:$4 sm:$0xff]  }
 0x1f4   :  { %2479 = vmatpush1.bf16.msra.mxu0 %v3828_v41  ;;  %2561 = vmatpush1.bf16.msra.mxu1 %v3831_v42  ;;  %v3914_v41 = vld [vmem:[#allocation7 + $0x3c4] ss:$16 sps:$4 sm:$0xff]   ;;  %v3917_v42 = vld [vmem:[#allocation7 + $0x3cc] ss:$16 sps:$4 sm:$0xff]  }
 0x1f5   :  { %2510 = vmatprep.mubr.bf16.mxu0 %v1646_v46  ;;  %2592 = vmatprep.mubr.bf16.mxu1 %v1646_v46  ;;  %v3920_v46 = vld [vmem:[#allocation7 + $0x3e4] ss:$16 sps:$4 sm:$0xff]  }
 0x1f6   :  { %2480 = vmatprep.subr.bf16.mxu0 %v3836_v44  ;;  %2562 = vmatprep.subr.bf16.mxu1 %v3839_v45  ;;  %v3915_v44 = vld [vmem:[#allocation7 + $0x3c8] ss:$16 sps:$4 sm:$0xff]   ;;  %v3383_v45 = vadd.f32 %v4209_v27, %v294_v40 }
 0x1f7   :  { %v3928_v27 = vld [vmem:[#allocation8 + $0x48] sm:$0xff]  }
 0x1f8   :  { %2481 = vmatpush1.bf16.msra.mxu0 %v3834_v47  ;;  %2563 = vmatpush1.bf16.msra.mxu1 %v3837_v48  ;;  %v3923_v47 = vld [vmem:[#allocation7 + $0x3ec] ss:$16 sps:$4 sm:$0xff]   ;;  %v3918_v48 = vld [vmem:[#allocation7 + $0x3e0] ss:$16 sps:$4 sm:$0xff]  }
 0x1f9   :  { %2482 = vmatprep.subr.bf16.mxu0 %v3842_v49  ;;  %2564 = vmatprep.subr.bf16.mxu1 %v3845_v50  ;;  %v3921_v49 = vld [vmem:[#allocation7 + $0x3e8] ss:$16 sps:$4 sm:$0xff]   ;;  %v1641_v50 = vmax.f32 %v3383_v45, 0.0 }
 0x1fc   :  { %2483 = vmatpush1.bf16.msra.mxu0 %v3840_v51  ;;  %2565 = vmatpush1.bf16.msra.mxu1 %v3843_v52  ;;  %v3925_v51 = vld [vmem:[#allocation8 + $0xc0] sm:$0xff]  }
 0x1fd   :  { %2484 = vmatprep.subr.bf16.mxu0 %v3848_v53  ;;  %2566 = vmatprep.subr.bf16.mxu1 %v3851_v54  ;;  %v3926_v52 = vld [vmem:[#allocation8] sm:$0xff]   ;;  %v1645_v54 = vpack.c.bf16 %v1641_v50, %v1641_v50 }
 0x1fe   :  { %v3927_v53 = vld [vmem:[#allocation8 + $0x80] sm:$0xff]  }
 0x200   :  { %2485 = vmatpush1.bf16.msra.mxu0 %v3846_v55  ;;  %2567 = vmatpush1.bf16.msra.mxu1 %v3849_v56  ;;  %v3929_v55 = vld [vmem:[#allocation8 + $0xc8] sm:$0xff]  }
 0x201   :  { %2486 = vmatprep.subr.bf16.mxu0 %v3854_v57  ;;  %2568 = vmatprep.subr.bf16.mxu1 %v3857_v58  ;;  %v3930_v56 = vld [vmem:[#allocation8 + $0x8] sm:$0xff]   ;;  %v3932_v58 = vld [vmem:[#allocation8 + $0x50] sm:$0xff]  }
 0x202   :  { %v3931_v57 = vld [vmem:[#allocation8 + $0x88] sm:$0xff]  }
 0x204   :  { %2487 = vmatpush1.bf16.msra.mxu0 %v3852_v59  ;;  %2569 = vmatpush1.bf16.msra.mxu1 %v3855_v60  ;;  %v3933_v59 = vld [vmem:[#allocation8 + $0xd0] sm:$0xff]  }
 0x205   :  { %2488 = vmatprep.subr.bf16.mxu0 %v3860_v61  ;;  %2570 = vmatprep.subr.bf16.mxu1 %v3863_v62  ;;  %v3934_v60 = vld [vmem:[#allocation8 + $0x10] sm:$0xff]   ;;  %v3936_v62 = vld [vmem:[#allocation8 + $0x58] sm:$0xff]  }
 0x206   :  { %v3935_v61 = vld [vmem:[#allocation8 + $0x90] sm:$0xff]  }
 0x208   :  { %2489 = vmatpush1.bf16.msra.mxu0 %v3858_v63  ;;  %2571 = vmatpush1.bf16.msra.mxu1 %v3861_v0  ;;  %v3937_v63 = vld [vmem:[#allocation8 + $0xd8] sm:$0xff]  }
 0x209   :  { %2490 = vmatprep.subr.bf16.mxu0 %v3866_v1  ;;  %2572 = vmatprep.subr.bf16.mxu1 %v3869_v2  ;;  %v3938_v0 = vld [vmem:[#allocation8 + $0x18] sm:$0xff]   ;;  %v3940_v2 = vld [vmem:[#allocation8 + $0x60] sm:$0xff]  }
 0x20a   :  { %v3939_v1 = vld [vmem:[#allocation8 + $0x98] sm:$0xff]  }
 0x20c   :  { %2491 = vmatpush1.bf16.msra.mxu0 %v3864_v3  ;;  %2573 = vmatpush1.bf16.msra.mxu1 %v3867_v4  ;;  %v3941_v3 = vld [vmem:[#allocation8 + $0xe0] sm:$0xff]  }
 0x20d   :  { %2492 = vmatprep.subr.bf16.mxu0 %v3872_v5  ;;  %2574 = vmatprep.subr.bf16.mxu1 %v3875_v6  ;;  %v3942_v4 = vld [vmem:[#allocation8 + $0x20] sm:$0xff]   ;;  %v3944_v6 = vld [vmem:[#allocation8 + $0x68] sm:$0xff]  }
 0x20e   :  { %v3943_v5 = vld [vmem:[#allocation8 + $0xa0] sm:$0xff]  }
 0x210   :  { %2493 = vmatpush1.bf16.msra.mxu0 %v3870_v7  ;;  %2575 = vmatpush1.bf16.msra.mxu1 %v3873_v8  ;;  %v3945_v7 = vld [vmem:[#allocation8 + $0xe8] sm:$0xff]  }
 0x211   :  { %2494 = vmatprep.subr.bf16.mxu0 %v3878_v9  ;;  %2576 = vmatprep.subr.bf16.mxu1 %v3881_v10  ;;  %v3946_v8 = vld [vmem:[#allocation8 + $0x28] sm:$0xff]   ;;  %v3948_v10 = vld [vmem:[#allocation8 + $0x70] sm:$0xff]  }
 0x212   :  { %v3947_v9 = vld [vmem:[#allocation8 + $0xa8] sm:$0xff]  }
 0x214   :  { %2495 = vmatpush1.bf16.msra.mxu0 %v3876_v12  ;;  %2577 = vmatpush1.bf16.msra.mxu1 %v3879_v13  ;;  %v3949_v12 = vld [vmem:[#allocation8 + $0xf0] sm:$0xff]  }
 0x215   :  { %2496 = vmatprep.subr.bf16.mxu0 %v3884_v14  ;;  %2578 = vmatprep.subr.bf16.mxu1 %v3887_v15  ;;  %v3950_v13 = vld [vmem:[#allocation8 + $0x30] sm:$0xff]   ;;  %v3952_v15 = vld [vmem:[#allocation8 + $0x78] sm:$0xff]  }
 0x216   :  { %v3951_v14 = vld [vmem:[#allocation8 + $0xb0] sm:$0xff]  }
 0x218   :  { %2497 = vmatpush1.bf16.msra.mxu0 %v3882_v16  ;;  %2579 = vmatpush1.bf16.msra.mxu1 %v3885_v17  ;;  %v3953_v16 = vld [vmem:[#allocation8 + $0xf8] sm:$0xff]  }
 0x219   :  { %2498 = vmatprep.subr.bf16.mxu0 %v3890_v18  ;;  %2580 = vmatprep.subr.bf16.mxu1 %v3893_v23  ;;  %v3954_v17 = vld [vmem:[#allocation8 + $0x38] sm:$0xff]   ;;  %v1775_v23 = vld [vmem:[%s4246_s4] sm:$0xf] }
 0x21a   :  { %v3955_v18 = vld [vmem:[#allocation8 + $0xb8] sm:$0xff]  }
 0x21c   :  { %2499 = vmatpush1.bf16.msra.mxu0 %v3888_v24  ;;  %2581 = vmatpush1.bf16.msra.mxu1 %v3891_v25  ;;  %v1780_v24 = vrot.slane %v1775_v23, %v285_v11  ;;  %v1788_v25 = vrot.slane %v1775_v23, %v293_v35 }
 0x21d   :  { %2500 = vmatprep.subr.bf16.mxu0 %v3896_v26  ;;  %2582 = vmatprep.subr.bf16.mxu1 %v3899_v28  ;;  %v1784_v26 = vrot.slane %v1775_v23, %v289_v21  ;;  %v1792_v28 = vrot.slane %v1775_v23, %v297_v22 }
 0x220   :  { %2501 = vmatpush1.bf16.msra.mxu0 %v3894_v29  ;;  %2583 = vmatpush1.bf16.msra.mxu1 %v3897_v30 }
 0x221   :  { %2502 = vmatprep.subr.bf16.mxu0 %v3902_v31  ;;  %2584 = vmatprep.subr.bf16.mxu1 %v3905_v32 }
 0x224   :  { %2503 = vmatpush1.bf16.msra.mxu0 %v3900_v33  ;;  %2585 = vmatpush1.bf16.msra.mxu1 %v3903_v34 }
 0x225   :  { %2504 = vmatprep.subr.bf16.mxu0 %v3908_v36  ;;  %2586 = vmatprep.subr.bf16.mxu1 %v3911_v37 }
 0x228   :  { %2505 = vmatpush1.bf16.msra.mxu0 %v3906_v38  ;;  %2587 = vmatpush1.bf16.msra.mxu1 %v3909_v39 }
 0x229   :  { %2506 = vmatprep.subr.bf16.mxu0 %v3914_v41  ;;  %2588 = vmatprep.subr.bf16.mxu1 %v3917_v42 }
 0x22c   :  { %2507 = vmatpush1.bf16.msra.mxu0 %v3912_v43  ;;  %2589 = vmatpush1.bf16.msra.mxu1 %v3915_v44 }
 0x22d   :  { %2508 = vmatprep.subr.bf16.mxu0 %v3920_v46  ;;  %2590 = vmatprep.subr.bf16.mxu1 %v3923_v47  ;;  %v3304_v47 = vld [vmem:[%s4248_s6] ss:$0 sm:$0xff] }
 0x230   :  { %2509 = vmatpush1.bf16.msra.mxu0 %v3918_v48  ;;  %2591 = vmatpush1.bf16.msra.mxu1 %v3921_v49 }
 0x231   :  { %3337 = vmatprep.subr.bf16.mxu0 %v3924_v20  ;;  %3359 = vmatprep.subr.bf16.mxu1 %v3925_v51 }
 0x233   :  { %2511 = vmatmul.mubr.bf16.vlgmr.msra.gmra.mrb[4].mxu0 %v1645_v54  ;;  %2593 = vmatmul.mubr.bf16.vlgmr.msra.gmra.mrb[4].mxu1 %v1645_v54 }
 0x234   :  { %3338 = vmatpush3.bf16.msra.mxu0 %v3926_v52  ;;  %3360 = vmatpush3.bf16.msra.mxu1 %v3927_v53 }
 0x235   :  { %3339 = vmatprep.subr.bf16.mxu0 %v3928_v27  ;;  %3361 = vmatprep.subr.bf16.mxu1 %v3929_v55 }
 0x238   :  { %3340 = vmatpush3.bf16.msra.mxu0 %v3930_v56  ;;  %3362 = vmatpush3.bf16.msra.mxu1 %v3931_v57 }
 0x239   :  { %3341 = vmatprep.subr.bf16.mxu0 %v3932_v58  ;;  %3363 = vmatprep.subr.bf16.mxu1 %v3933_v59 }
 0x23c   :  { %3342 = vmatpush3.bf16.msra.mxu0 %v3934_v60  ;;  %3364 = vmatpush3.bf16.msra.mxu1 %v3935_v61 }
 0x23d   :  { %3343 = vmatprep.subr.bf16.mxu0 %v3936_v62  ;;  %3365 = vmatprep.subr.bf16.mxu1 %v3937_v63 }
 0x240   :  { %3344 = vmatpush3.bf16.msra.mxu0 %v3938_v0  ;;  %3366 = vmatpush3.bf16.msra.mxu1 %v3939_v1 }
 0x241   :  { %3345 = vmatprep.subr.bf16.mxu0 %v3940_v2  ;;  %3367 = vmatprep.subr.bf16.mxu1 %v3941_v3 }
 0x244   :  { %3346 = vmatpush3.bf16.msra.mxu0 %v3942_v4  ;;  %3368 = vmatpush3.bf16.msra.mxu1 %v3943_v5 }
 0x245   :  { %3347 = vmatprep.subr.bf16.mxu0 %v3944_v6  ;;  %3369 = vmatprep.subr.bf16.mxu1 %v3945_v7 }
 0x248   :  { %3348 = vmatpush3.bf16.msra.mxu0 %v3946_v8  ;;  %3370 = vmatpush3.bf16.msra.mxu1 %v3947_v9 }
 0x249   :  { %3349 = vmatprep.subr.bf16.mxu0 %v3948_v10  ;;  %3371 = vmatprep.subr.bf16.mxu1 %v3949_v12 }
 0x24c   :  { %3350 = vmatpush3.bf16.msra.mxu0 %v3950_v13  ;;  %3372 = vmatpush3.bf16.msra.mxu1 %v3951_v14 }
 0x24d   :  { %3351 = vmatprep.subr.bf16.mxu0 %v3952_v15  ;;  %3373 = vmatprep.subr.bf16.mxu1 %v3953_v16 }
 0x250   :  { %3352 = vmatpush3.bf16.msra.mxu0 %v3954_v17  ;;  %3374 = vmatpush3.bf16.msra.mxu1 %v3955_v18 }
 0x306   :  { %v2512_v29 = vpop.f32.mrb[4].mxu0  ;;  %v2594_v30 = vpop.f32.mrb[4].mxu1 }
 0x307   :  { %v3385_v31 = vadd.f32 %v2512_v29, %v1780_v24  ;;  %v3387_v32 = vadd.f32 %v2594_v30, %v1788_v25  ;;  %v2514_v33 = vpop.f32.mrb[5].mxu0  ;;  %v2596_v34 = vpop.f32.mrb[5].mxu1 }
 0x308   :  { %v3386_v36 = vadd.f32 %v2514_v33, %v1784_v26  ;;  %v3388_v37 = vadd.f32 %v2596_v34, %v1792_v28  ;;  %v2516_v38 = vpop.f32.mrb[6].mxu0  ;;  %v2598_v39 = vpop.f32.mrb[6].mxu1 }
 0x309   :  { %v2601_v11 = vmax.f32 %v3385_v31, 0.0  ;;  %v2603_v40 = vmax.f32 %v3387_v32, 0.0  ;;  %v2517_v41 = vpop.f32.mrb[7].mxu0  ;;  %v2599_v35 = vpop.f32.mrb[7].mxu1 }
 0x30a   :  { %v2602_v42 = vmax.f32 %v3386_v36, 0.0  ;;  %v2604_v43 = vmax.f32 %v3388_v37, 0.0 }
 0x30b   :  { %v2605_v19 = vpack.c.bf16 %v2601_v11, %v2601_v11  ;;  %v2607_v22 = vpack.c.bf16 %v2603_v40, %v2603_v40 }
 0x30c   :  { %v2606_v21 = vpack.c.bf16 %v2602_v42, %v2602_v42  ;;  %v2608_v44 = vpack.c.bf16 %v2604_v43, %v2604_v43 }
 0x30e   :  { %2904 = vmatprep.mubr.bf16.mxu0 %v2606_v21  ;;  %2944 = vmatprep.mubr.bf16.mxu1 %v2608_v44 }
 0x30f   :  { %2905 = vmatmul.mubr.bf16.vlgmr.msra.gmra.mrb[8].mxu0 %v2605_v19  ;;  %2945 = vmatmul.mubr.bf16.vlgmr.msra.gmra.mrb[8].mxu1 %v2607_v22 }
 0x3e2   :  { %v3353_v45 = vpop.f32.mrb[8].mxu0  ;;  %v3375_v46 = vpop.f32.mrb[8].mxu1 }
 0x3e3   :  { %v3354_v48 = vpop.f32.mrb[9].mxu0  ;;  %v3376_v49 = vpop.f32.mrb[9].mxu1 }
 0x3e4   :  { %v3355_v50 = vadd.f32 %v3354_v48, %v3353_v45  ;;  %v3377_v20 = vadd.f32 %v3376_v49, %v3375_v46  ;;  %v3356_v51 = vpop.f32.mrb[10].mxu0  ;;  %v3378_v52 = vpop.f32.mrb[10].mxu1 }
 0x3e5   :  { %v3357_v53 = vpop.f32.mrb[11].mxu0  ;;  %v3379_v54 = vpop.f32.mrb[11].mxu1 }
 0x3e6   :  { %v2907_v27 = vadd.f32 %v3355_v50, %v3304_v47 }
 0x3e8   :  { %v2947_v55 = vadd.f32 %v3377_v20, %v2907_v27 }
 0x3ea   :  { %v2952_v56 = vpack.c.bf16 %v2947_v55, %v2947_v55 }
 0x3ec   :  { %2953 = vst [vmem:[#allocation10] sm:$0xf] %v2952_v56 }
 0x3ed   :  { %4055 = shalt.err (!%p4052_p8)
}
 0x3ee   :  { %s4056_s10 = scalar_lea.hbm %s4249_s7, 64 }
 0x3ef   :  { %p4057_p9 = scmp.ne.s32.totalorder %s4249_s7, %s4056_s10  ;;  %p4060_p10 = scmp.lt.u32.totalorder %s4056_s10, %s4249_s7 }
 0x3f1   :  { %p4062_p11 = pnand %p4060_p10, %p4057_p9 }
 0x3f3   :  { %4065 = shalt.err (!%p4062_p11)
}
 0x3f4   :  { %2963 = dma.vmem_to_hbm [thread:$0]  %s2961_s30, 64, %s4249_s7, [#allocation4]  }
 0x3f5   :  { %4072 = dma.done.wait [#allocation4], 64  }
 0x3f6   :  { %4073 = vsyncadd [#allocation4], 4294967232 }
 0x3f7   :  { %2967 = vsyncpa [#allocation3], 1 }
 0x3f8   :  { %2968 = vsyncpa [#allocation6], 1 }
 0x3f9   :  { %2969 = vsyncpa [#allocation9], 1 }
 0x3fa   :  { %2970 = vsyncpa [#allocation4], 1 }

</bundles_post_ra>
